<compile_context>
chip_gen: v6e
topology: v6e:2x2x1
jax: 0.10.0
libtpu: 0.0.40
codegen_flags: <defaults>
</compile_context>

<pallas_src>
import functools

import jax
import jax.numpy as jnp
from jax.experimental import pallas as pl
from jax.experimental.pallas import tpu as pltpu


# ----------------------------------------------------------------------------
# Fused Pallas kernel: L GIN layers + prediction heads, no grid
# ----------------------------------------------------------------------------
def fused_gin_kernel(h_ref, a_ref,
                     w1_ref, b1_ref, w2_ref, b2_ref,
                     sn_ref, tn_ref,
                     wp_ref, bp_ref, out_ref,
                     *, eps, residual):
    h = h_ref[...]                                   # [N, Hp] f32
    a = a_ref[...].astype(jnp.bfloat16)              # int8 0/1 -> bf16 (exact)
    hb = h.astype(jnp.bfloat16)

    # prediction head 0; all (L+1) head biases were summed host-side into bp
    acc = jnp.dot(hb, wp_ref[0],
                  preferred_element_type=jnp.float32) + bp_ref[...]

    for l in range(len(eps)):                        # static unroll (L=2)
        # neighbor sum on the MXU (bf16 in, f32 accumulate) + (1+eps)*self
        neigh = jnp.dot(a, hb, preferred_element_type=jnp.float32)
        z = (1.0 + eps[l]) * h + neigh
        # MLP layer 1: Linear (+ folded eval-mode BN1) -> ReLU
        t = jnp.maximum(
            jnp.dot(z.astype(jnp.bfloat16), w1_ref[l],
                    preferred_element_type=jnp.float32) + b1_ref[l], 0.0)
        # MLP layer 2: Linear (+ folded ApplyNodeFunc BN) -> ReLU
        m = jnp.dot(t.astype(jnp.bfloat16), w2_ref[l],
                    preferred_element_type=jnp.float32) + b2_ref[l]
        act = jnp.maximum(m, 0.0)
        # GINLayer bn_node_h (ReLU in between -> cannot be folded) -> ReLU
        o = jnp.maximum(act * sn_ref[l] + tn_ref[l], 0.0)
        h = h + o if residual else o                 # residual; dropout = id (eval)
        hb = h.astype(jnp.bfloat16)
        # prediction head l+1 accumulated in-place (no concat copy)
        acc = acc + jnp.dot(hb, wp_ref[l + 1],
                            preferred_element_type=jnp.float32)

    out_ref[...] = acc                               # one unmasked lane-dense store


# ----------------------------------------------------------------------------
# Wrapper
# ----------------------------------------------------------------------------
def gin_mod_net_forward(A_i8, labels, packed, *, n_classes, residual=True):
    # Embedding lookup (integer gather) stays in plain-JAX glue.
    h0 = packed["emb"][labels]                       # [N, Hp] f32
    N = h0.shape[0]
    Cp = packed["wp"].shape[-1]

    kern = functools.partial(fused_gin_kernel,
                             eps=packed["eps"], residual=residual)
    # TODO(synk): for large N add a row-tile grid over A/h/out: mark the node
    #   axis dimension_semantics=("parallel",) (v7x has 2 TensorCores), use
    #   >=256-row tiles to fill the 256x256 MXU on v6e/v7x (128 on v5e), keep
    #   weights/full-h resident via index_map -> block 0, and size tiles +
    #   pltpu.CompilerParams(vmem_limit_bytes=...) against v7x's 64 MiB VMEM.
    # TODO(synk): many small graphs should be batched into one call
    #   (block-diagonal A or a leading batch grid axis) to amortize launch/DMA
    #   overhead -- at N=128 that fixed cost dominates everything in-kernel.
    out = pl.pallas_call(
        kern,
        out_shape=jax.ShapeDtypeStruct((N, Cp), jnp.float32),
        in_specs=[pl.BlockSpec(memory_space=pltpu.MemorySpace.VMEM)] * 10,
        out_specs=pl.BlockSpec(memory_space=pltpu.MemorySpace.VMEM),
    )(h0, A_i8,
      packed["w1"], packed["b1"], packed["w2"], packed["b2"],
      packed["sn"], packed["tn"],
      packed["wp"], packed["bp"])
    return out[:, :n_classes]                        # drop lane padding


# ----------------------------------------------------------------------------
# Parameters (deterministic synthetic; eval-mode BN folded; lane padding)
# ----------------------------------------------------------------------------
def fold_bn(key, H):
    # eval-mode BatchNorm expressed as y = x*scale + shift
    k1, k2, k3, k4 = jax.random.split(key, 4)
    gamma = 1.0 + 0.1 * jax.random.normal(k1, (1, H), jnp.float32)
    beta = 0.1 * jax.random.normal(k2, (1, H), jnp.float32)
    mean = 0.1 * jax.random.normal(k3, (1, H), jnp.float32)
    var = 1.0 + 0.1 * jax.random.uniform(k4, (1, H), jnp.float32)
    scale = gamma / jnp.sqrt(var + 1e-5)
    shift = beta - mean * scale
    return scale, shift


def _pad_to(x, shape):
    return jnp.pad(x, [(0, s - d) for d, s in zip(x.shape, shape)])


def make_params(key, in_dim, H, C, L, Hp, Cp):
    keys = jax.random.split(key, 2 + L)
    emb = 0.5 * jax.random.normal(keys[0], (in_dim, H), jnp.float32)

    layers = []
    for l in range(L):
        ks = jax.random.split(keys[1 + l], 7)
        s1, t1 = fold_bn(ks[4], H)    # BN inside MLP (after Linear1)
        sa, ta = fold_bn(ks[5], H)    # ApplyNodeFunc BN (after Linear2)
        sn, tn = fold_bn(ks[6], H)    # GINLayer bn_node_h
        layers.append(dict(
            eps=0.05 * (l + 1),
            w1=jax.random.normal(ks[0], (H, H), jnp.float32) / jnp.sqrt(H),
            b1=0.1 * jax.random.normal(ks[1], (1, H), jnp.float32),
            w2=jax.random.normal(ks[2], (H, H), jnp.float32) / jnp.sqrt(H),
            b2=0.1 * jax.random.normal(ks[3], (1, H), jnp.float32),
            s1=s1, t1=t1, sa=sa, ta=ta, sn=sn, tn=tn,
        ))

    kp, kb = jax.random.split(keys[1 + L], 2)
    Wp = jax.random.normal(kp, (L + 1, H, C), jnp.float32) / jnp.sqrt(H)
    bp = 0.1 * jax.random.normal(kb, (L + 1, 1, C), jnp.float32)

    raw = dict(emb=emb, layers=layers, Wp=Wp, bp=bp)

    # Fold eval-mode BN into the preceding Linear (f32, mathematically exact):
    #   (x @ W + b) * s + t  ==  x @ (W * s) + (b * s + t)
    w1f = [p["w1"] * p["s1"] for p in layers]
    b1f = [p["b1"] * p["s1"] + p["t1"] for p in layers]
    w2f = [p["w2"] * p["sa"] for p in layers]
    b2f = [p["b2"] * p["sa"] + p["ta"] for p in layers]

    def stack_mat(mats, shape, dtype):
        return jnp.stack([_pad_to(m, shape) for m in mats]).astype(dtype)

    def stack_vec(vecs):
        return jnp.stack([_pad_to(v.reshape(-1), (Hp,)) for v in vecs])

    packed = dict(
        emb=_pad_to(emb, (in_dim, Hp)),
        eps=tuple(float(p["eps"]) for p in layers),      # static, baked in kernel
        w1=stack_mat(w1f, (Hp, Hp), jnp.bfloat16),       # [L, Hp, Hp] bf16
        b1=stack_vec(b1f),                               # [L, Hp] f32
        w2=stack_mat(w2f, (Hp, Hp), jnp.bfloat16),
        b2=stack_vec(b2f),
        sn=stack_vec([p["sn"] for p in layers]),
        tn=stack_vec([p["tn"] for p in layers]),
        wp=stack_mat([Wp[i] for i in range(L + 1)], (Hp, Cp), jnp.bfloat16),
        bp=_pad_to(jnp.sum(bp, axis=0), (1, Cp)),        # all head biases summed
    )
    return raw, packed


# ----------------------------------------------------------------------------
# Pure-JAX reference mirroring the kernel's dtype policy (bf16 MXU operands,
# f32 accumulation, BN-into-Linear fold done in f32 which is exact math).
# ----------------------------------------------------------------------------
def reference_forward(A_i8, labels, raw, *, residual=True):
    h = raw["emb"][labels]
    a = A_i8.astype(jnp.bfloat16)
    hb = h.astype(jnp.bfloat16)
    score = jnp.dot(hb, raw["Wp"][0].astype(jnp.bfloat16),
                    preferred_element_type=jnp.float32) + raw["bp"][0]
    for i, p in enumerate(raw["layers"]):
        w1f = (p["w1"] * p["s1"]).astype(jnp.bfloat16)
        b1f = p["b1"] * p["s1"] + p["t1"]
        w2f = (p["w2"] * p["sa"]).astype(jnp.bfloat16)
        b2f = p["b2"] * p["sa"] + p["ta"]
        neigh = jnp.dot(a, hb, preferred_element_type=jnp.float32)
        z = (1.0 + p["eps"]) * h + neigh
        t = jnp.maximum(jnp.dot(z.astype(jnp.bfloat16), w1f,
                                preferred_element_type=jnp.float32) + b1f, 0.0)
        m = jnp.dot(t.astype(jnp.bfloat16), w2f,
                    preferred_element_type=jnp.float32) + b2f
        o = jnp.maximum(jnp.maximum(m, 0.0) * p["sn"] + p["tn"], 0.0)
        h = h + o if residual else o
        hb = h.astype(jnp.bfloat16)
        score = score + jnp.dot(hb, raw["Wp"][i + 1].astype(jnp.bfloat16),
                                preferred_element_type=jnp.float32) + raw["bp"][i + 1]
    return score


# ----------------------------------------------------------------------------
# Main
# ----------------------------------------------------------------------------
if __name__ == "__main__":
    # net_params: in_dim=8, hidden_dim=32, n_classes=6, L=2, n_mlp_GIN=2,
    #             learn_eps=True, batch_norm=True, residual=True, sum aggregation
    in_dim, H, C, L = 8, 32, 6, 2
    Hp, Cp = 128, 128          # lane-dense padded widths
    N = 128                    # nodes in the batched graph (fills the row dim)

    key = jax.random.PRNGKey(0)
    k_lab, k_adj, k_par = jax.random.split(key, 3)

    labels = jax.random.randint(k_lab, (N,), 0, in_dim, jnp.int32)
    A = (jax.random.uniform(k_adj, (N, N)) < 0.1).astype(jnp.float32)
    A = A * (1.0 - jnp.eye(N, dtype=jnp.float32))         # no self loops
    A_i8 = A.astype(jnp.int8)                             # 0/1 exact; half the bytes

    raw, packed = make_params(k_par, in_dim, H, C, L, Hp, Cp)

    scores = gin_mod_net_forward(A_i8, labels, packed, n_classes=C, residual=True)
    jax.block_until_ready(scores)
    assert scores.shape == (N, C) and scores.dtype == jnp.float32

    ref = reference_forward(A_i8, labels, raw, residual=True)
    assert jnp.allclose(scores, ref, atol=5e-2, rtol=5e-2), float(
        jnp.max(jnp.abs(scores - ref)))
    print("KERNEL_OK")
</pallas_src>

<mosaic_0001>
module attributes {stable_mosaic.version = 11 : i64} {
  func.func @fused_gin_kernel(%arg0: memref<128x128xf32, #tpu.memory_space<vmem>>, %arg1: memref<128x128xi8, #tpu.memory_space<vmem>>, %arg2: memref<2x128x128xbf16, #tpu.memory_space<vmem>>, %arg3: memref<2x128xf32, #tpu.memory_space<vmem>>, %arg4: memref<2x128x128xbf16, #tpu.memory_space<vmem>>, %arg5: memref<2x128xf32, #tpu.memory_space<vmem>>, %arg6: memref<2x128xf32, #tpu.memory_space<vmem>>, %arg7: memref<2x128xf32, #tpu.memory_space<vmem>>, %arg8: memref<3x128x128xbf16, #tpu.memory_space<vmem>>, %arg9: memref<1x128xf32, #tpu.memory_space<vmem>>, %arg10: memref<128x128xf32, #tpu.memory_space<vmem>>) attributes {dimension_semantics = [], scalar_prefetch = 0 : i64, scratch_operands = 0 : i64, tpu.core_type = #tpu.core_type<tc>} {
    %c0 = arith.constant 0 : index
    %c0_0 = arith.constant 0 : index
    %0 = vector.load %arg0[%c0, %c0_0] : memref<128x128xf32, #tpu.memory_space<vmem>>, vector<128x128xf32>
    %c0_1 = arith.constant 0 : index
    %c0_2 = arith.constant 0 : index
    %1 = vector.load %arg1[%c0_1, %c0_2] : memref<128x128xi8, #tpu.memory_space<vmem>>, vector<128x128xi8>
    %2 = arith.sitofp %1 : vector<128x128xi8> to vector<128x128xbf16>
    %3 = arith.truncf %0 : vector<128x128xf32> to vector<128x128xbf16>
    %c0_3 = arith.constant 0 : index
    %c0_4 = arith.constant 0 : index
    %c0_5 = arith.constant 0 : index
    %4 = vector.load %arg8[%c0_3, %c0_4, %c0_5] : memref<3x128x128xbf16, #tpu.memory_space<vmem>>, vector<1x128x128xbf16>
    %5 = vector.shape_cast %4 : vector<1x128x128xbf16> to vector<128x128xbf16>
    %cst = arith.constant dense<0.000000e+00> : vector<128x128xf32>
    %6 = tpu.matmul %3, %5, %cst {dimension_numbers = #tpu.dot_dimension_numbers<[1], [0], [0], [1], [0, 0, 1, 1], [], []>} : vector<128x128xbf16>, vector<128x128xbf16>, vector<128x128xf32> -> vector<128x128xf32>
    %c0_6 = arith.constant 0 : index
    %c0_7 = arith.constant 0 : index
    %7 = vector.load %arg9[%c0_6, %c0_7] : memref<1x128xf32, #tpu.memory_space<vmem>>, vector<1x128xf32>
    %8 = vector.broadcast %7 : vector<1x128xf32> to vector<128x128xf32>
    %9 = arith.addf %6, %8 : vector<128x128xf32>
    %cst_8 = arith.constant dense<0.000000e+00> : vector<128x128xf32>
    %10 = tpu.matmul %2, %3, %cst_8 {dimension_numbers = #tpu.dot_dimension_numbers<[1], [0], [0], [1], [0, 0, 1, 1], [], []>} : vector<128x128xbf16>, vector<128x128xbf16>, vector<128x128xf32> -> vector<128x128xf32>
    %cst_9 = arith.constant 1.050000e+00 : f32
    %11 = vector.broadcast %cst_9 : f32 to vector<128x128xf32>
    %12 = arith.mulf %11, %0 : vector<128x128xf32>
    %13 = arith.addf %12, %10 : vector<128x128xf32>
    %14 = arith.truncf %13 : vector<128x128xf32> to vector<128x128xbf16>
    %c0_10 = arith.constant 0 : index
    %c0_11 = arith.constant 0 : index
    %c0_12 = arith.constant 0 : index
    %15 = vector.load %arg2[%c0_10, %c0_11, %c0_12] : memref<2x128x128xbf16, #tpu.memory_space<vmem>>, vector<1x128x128xbf16>
    %16 = vector.shape_cast %15 : vector<1x128x128xbf16> to vector<128x128xbf16>
    %cst_13 = arith.constant dense<0.000000e+00> : vector<128x128xf32>
    %17 = tpu.matmul %14, %16, %cst_13 {dimension_numbers = #tpu.dot_dimension_numbers<[1], [0], [0], [1], [0, 0, 1, 1], [], []>} : vector<128x128xbf16>, vector<128x128xbf16>, vector<128x128xf32> -> vector<128x128xf32>
    %c0_14 = arith.constant 0 : index
    %c0_15 = arith.constant 0 : index
    %18 = vector.load %arg3[%c0_14, %c0_15] : memref<2x128xf32, #tpu.memory_space<vmem>>, vector<1x128xf32>
    %19 = vector.shape_cast %18 : vector<1x128xf32> to vector<128xf32>
    %20 = vector.shape_cast %19 : vector<128xf32> to vector<1x128xf32>
    %21 = vector.broadcast %20 : vector<1x128xf32> to vector<128x128xf32>
    %22 = arith.addf %17, %21 : vector<128x128xf32>
    %cst_16 = arith.constant 0.000000e+00 : f32
    %23 = vector.broadcast %cst_16 : f32 to vector<128x128xf32>
    %24 = arith.maximumf %22, %23 : vector<128x128xf32>
    %25 = arith.truncf %24 : vector<128x128xf32> to vector<128x128xbf16>
    %c0_17 = arith.constant 0 : index
    %c0_18 = arith.constant 0 : index
    %c0_19 = arith.constant 0 : index
    %26 = vector.load %arg4[%c0_17, %c0_18, %c0_19] : memref<2x128x128xbf16, #tpu.memory_space<vmem>>, vector<1x128x128xbf16>
    %27 = vector.shape_cast %26 : vector<1x128x128xbf16> to vector<128x128xbf16>
    %cst_20 = arith.constant dense<0.000000e+00> : vector<128x128xf32>
    %28 = tpu.matmul %25, %27, %cst_20 {dimension_numbers = #tpu.dot_dimension_numbers<[1], [0], [0], [1], [0, 0, 1, 1], [], []>} : vector<128x128xbf16>, vector<128x128xbf16>, vector<128x128xf32> -> vector<128x128xf32>
    %c0_21 = arith.constant 0 : index
    %c0_22 = arith.constant 0 : index
    %29 = vector.load %arg5[%c0_21, %c0_22] : memref<2x128xf32, #tpu.memory_space<vmem>>, vector<1x128xf32>
    %30 = vector.shape_cast %29 : vector<1x128xf32> to vector<128xf32>
    %31 = vector.shape_cast %30 : vector<128xf32> to vector<1x128xf32>
    %32 = vector.broadcast %31 : vector<1x128xf32> to vector<128x128xf32>
    %33 = arith.addf %28, %32 : vector<128x128xf32>
    %cst_23 = arith.constant 0.000000e+00 : f32
    %34 = vector.broadcast %cst_23 : f32 to vector<128x128xf32>
    %35 = arith.maximumf %33, %34 : vector<128x128xf32>
    %c0_24 = arith.constant 0 : index
    %c0_25 = arith.constant 0 : index
    %36 = vector.load %arg6[%c0_24, %c0_25] : memref<2x128xf32, #tpu.memory_space<vmem>>, vector<1x128xf32>
    %37 = vector.shape_cast %36 : vector<1x128xf32> to vector<128xf32>
    %38 = vector.shape_cast %37 : vector<128xf32> to vector<1x128xf32>
    %39 = vector.broadcast %38 : vector<1x128xf32> to vector<128x128xf32>
    %40 = arith.mulf %35, %39 : vector<128x128xf32>
    %c0_26 = arith.constant 0 : index
    %c0_27 = arith.constant 0 : index
    %41 = vector.load %arg7[%c0_26, %c0_27] : memref<2x128xf32, #tpu.memory_space<vmem>>, vector<1x128xf32>
    %42 = vector.shape_cast %41 : vector<1x128xf32> to vector<128xf32>
    %43 = vector.shape_cast %42 : vector<128xf32> to vector<1x128xf32>
    %44 = vector.broadcast %43 : vector<1x128xf32> to vector<128x128xf32>
    %45 = arith.addf %40, %44 : vector<128x128xf32>
    %cst_28 = arith.constant 0.000000e+00 : f32
    %46 = vector.broadcast %cst_28 : f32 to vector<128x128xf32>
    %47 = arith.maximumf %45, %46 : vector<128x128xf32>
    %48 = arith.addf %0, %47 : vector<128x128xf32>
    %49 = arith.truncf %48 : vector<128x128xf32> to vector<128x128xbf16>
    %c1 = arith.constant 1 : index
    %c0_29 = arith.constant 0 : index
    %c0_30 = arith.constant 0 : index
    %50 = vector.load %arg8[%c1, %c0_29, %c0_30] : memref<3x128x128xbf16, #tpu.memory_space<vmem>>, vector<1x128x128xbf16>
    %51 = vector.shape_cast %50 : vector<1x128x128xbf16> to vector<128x128xbf16>
    %cst_31 = arith.constant dense<0.000000e+00> : vector<128x128xf32>
    %52 = tpu.matmul %49, %51, %cst_31 {dimension_numbers = #tpu.dot_dimension_numbers<[1], [0], [0], [1], [0, 0, 1, 1], [], []>} : vector<128x128xbf16>, vector<128x128xbf16>, vector<128x128xf32> -> vector<128x128xf32>
    %53 = arith.addf %9, %52 : vector<128x128xf32>
    %cst_32 = arith.constant dense<0.000000e+00> : vector<128x128xf32>
    %54 = tpu.matmul %2, %49, %cst_32 {dimension_numbers = #tpu.dot_dimension_numbers<[1], [0], [0], [1], [0, 0, 1, 1], [], []>} : vector<128x128xbf16>, vector<128x128xbf16>, vector<128x128xf32> -> vector<128x128xf32>
    %cst_33 = arith.constant 1.100000e+00 : f32
    %55 = vector.broadcast %cst_33 : f32 to vector<128x128xf32>
    %56 = arith.mulf %55, %48 : vector<128x128xf32>
    %57 = arith.addf %56, %54 : vector<128x128xf32>
    %58 = arith.truncf %57 : vector<128x128xf32> to vector<128x128xbf16>
    %c1_34 = arith.constant 1 : index
    %c0_35 = arith.constant 0 : index
    %c0_36 = arith.constant 0 : index
    %59 = vector.load %arg2[%c1_34, %c0_35, %c0_36] : memref<2x128x128xbf16, #tpu.memory_space<vmem>>, vector<1x128x128xbf16>
    %60 = vector.shape_cast %59 : vector<1x128x128xbf16> to vector<128x128xbf16>
    %cst_37 = arith.constant dense<0.000000e+00> : vector<128x128xf32>
    %61 = tpu.matmul %58, %60, %cst_37 {dimension_numbers = #tpu.dot_dimension_numbers<[1], [0], [0], [1], [0, 0, 1, 1], [], []>} : vector<128x128xbf16>, vector<128x128xbf16>, vector<128x128xf32> -> vector<128x128xf32>
    %c1_38 = arith.constant 1 : index
    %c0_39 = arith.constant 0 : index
    %62 = vector.load %arg3[%c1_38, %c0_39] : memref<2x128xf32, #tpu.memory_space<vmem>>, vector<1x128xf32>
    %63 = vector.shape_cast %62 : vector<1x128xf32> to vector<128xf32>
    %64 = vector.shape_cast %63 : vector<128xf32> to vector<1x128xf32>
    %65 = vector.broadcast %64 : vector<1x128xf32> to vector<128x128xf32>
    %66 = arith.addf %61, %65 : vector<128x128xf32>
    %cst_40 = arith.constant 0.000000e+00 : f32
    %67 = vector.broadcast %cst_40 : f32 to vector<128x128xf32>
    %68 = arith.maximumf %66, %67 : vector<128x128xf32>
    %69 = arith.truncf %68 : vector<128x128xf32> to vector<128x128xbf16>
    %c1_41 = arith.constant 1 : index
    %c0_42 = arith.constant 0 : index
    %c0_43 = arith.constant 0 : index
    %70 = vector.load %arg4[%c1_41, %c0_42, %c0_43] : memref<2x128x128xbf16, #tpu.memory_space<vmem>>, vector<1x128x128xbf16>
    %71 = vector.shape_cast %70 : vector<1x128x128xbf16> to vector<128x128xbf16>
    %cst_44 = arith.constant dense<0.000000e+00> : vector<128x128xf32>
    %72 = tpu.matmul %69, %71, %cst_44 {dimension_numbers = #tpu.dot_dimension_numbers<[1], [0], [0], [1], [0, 0, 1, 1], [], []>} : vector<128x128xbf16>, vector<128x128xbf16>, vector<128x128xf32> -> vector<128x128xf32>
    %c1_45 = arith.constant 1 : index
    %c0_46 = arith.constant 0 : index
    %73 = vector.load %arg5[%c1_45, %c0_46] : memref<2x128xf32, #tpu.memory_space<vmem>>, vector<1x128xf32>
    %74 = vector.shape_cast %73 : vector<1x128xf32> to vector<128xf32>
    %75 = vector.shape_cast %74 : vector<128xf32> to vector<1x128xf32>
    %76 = vector.broadcast %75 : vector<1x128xf32> to vector<128x128xf32>
    %77 = arith.addf %72, %76 : vector<128x128xf32>
    %cst_47 = arith.constant 0.000000e+00 : f32
    %78 = vector.broadcast %cst_47 : f32 to vector<128x128xf32>
    %79 = arith.maximumf %77, %78 : vector<128x128xf32>
    %c1_48 = arith.constant 1 : index
    %c0_49 = arith.constant 0 : index
    %80 = vector.load %arg6[%c1_48, %c0_49] : memref<2x128xf32, #tpu.memory_space<vmem>>, vector<1x128xf32>
    %81 = vector.shape_cast %80 : vector<1x128xf32> to vector<128xf32>
    %82 = vector.shape_cast %81 : vector<128xf32> to vector<1x128xf32>
    %83 = vector.broadcast %82 : vector<1x128xf32> to vector<128x128xf32>
    %84 = arith.mulf %79, %83 : vector<128x128xf32>
    %c1_50 = arith.constant 1 : index
    %c0_51 = arith.constant 0 : index
    %85 = vector.load %arg7[%c1_50, %c0_51] : memref<2x128xf32, #tpu.memory_space<vmem>>, vector<1x128xf32>
    %86 = vector.shape_cast %85 : vector<1x128xf32> to vector<128xf32>
    %87 = vector.shape_cast %86 : vector<128xf32> to vector<1x128xf32>
    %88 = vector.broadcast %87 : vector<1x128xf32> to vector<128x128xf32>
    %89 = arith.addf %84, %88 : vector<128x128xf32>
    %cst_52 = arith.constant 0.000000e+00 : f32
    %90 = vector.broadcast %cst_52 : f32 to vector<128x128xf32>
    %91 = arith.maximumf %89, %90 : vector<128x128xf32>
    %92 = arith.addf %48, %91 : vector<128x128xf32>
    %93 = arith.truncf %92 : vector<128x128xf32> to vector<128x128xbf16>
    %c2 = arith.constant 2 : index
    %c0_53 = arith.constant 0 : index
    %c0_54 = arith.constant 0 : index
    %94 = vector.load %arg8[%c2, %c0_53, %c0_54] : memref<3x128x128xbf16, #tpu.memory_space<vmem>>, vector<1x128x128xbf16>
    %95 = vector.shape_cast %94 : vector<1x128x128xbf16> to vector<128x128xbf16>
    %cst_55 = arith.constant dense<0.000000e+00> : vector<128x128xf32>
    %96 = tpu.matmul %93, %95, %cst_55 {dimension_numbers = #tpu.dot_dimension_numbers<[1], [0], [0], [1], [0, 0, 1, 1], [], []>} : vector<128x128xbf16>, vector<128x128xbf16>, vector<128x128xf32> -> vector<128x128xf32>
    %97 = arith.addf %53, %96 : vector<128x128xf32>
    %c0_56 = arith.constant 0 : index
    %c0_57 = arith.constant 0 : index
    %98 = vector.load %arg10[%c0_56, %c0_57] : memref<128x128xf32, #tpu.memory_space<vmem>>, vector<128x128xf32>
    tpu.vector_store %arg10[%c0_56, %c0_57], %97 {strides = array<i32>} : memref<128x128xf32, #tpu.memory_space<vmem>>, vector<128x128xf32>,
    return
  }
}

</mosaic_0001>

<bundles_post_ra>
// kernel: tpu_custom_call.1
= control target key start
LH: loop header
LB: loop body
LE: loop exit
PB: predicated region body
PF: predicated region fallthrough
CT: control target
= control target key end

     0   :  { %15 = vsyncpa [#allocation3], 0  ;;  %s3179_s0 = inlined_call_operand.hbm [shape: f32[128,128], index: 0, kind: input, shape index: {}]   ;;  %s3180_s1 = inlined_call_operand.hbm [shape: s8[128,128], index: 1, kind: input, shape index: {}]   ;;  %s3181_s2 = inlined_call_operand.hbm [shape: bf16[2,128,128], index: 2, kind: input, shape index: {}]   ;;  %s3182_s3 = inlined_call_operand.vmem [shape: f32[2,128], index: 3, kind: input, shape index: {}]   ;;  %s3183_s4 = inlined_call_operand.hbm [shape: bf16[2,128,128], index: 4, kind: input, shape index: {}]   ;;  %s3184_s5 = inlined_call_operand.vmem [shape: f32[2,128], index: 5, kind: input, shape index: {}]   ;;  %s3185_s6 = inlined_call_operand.vmem [shape: f32[2,128], index: 6, kind: input, shape index: {}]   ;;  %s3186_s7 = inlined_call_operand.vmem [shape: f32[2,128], index: 7, kind: input, shape index: {}]   ;;  %s3187_s8 = inlined_call_operand.hbm [shape: bf16[3,128,128], index: 8, kind: input, shape index: {}]   ;;  %s3188_s9 = inlined_call_operand.vmem [shape: f32[1,128], index: 9, kind: input, shape index: {}]   ;;  %s3189_s10 = inlined_call_operand.hbm [shape: f32[128,128], index: 10, kind: output, shape index: {}]  }
   0x1   :  { %16 = vsyncpa [#allocation6], 0 }
   0x2   :  { %17 = vsyncpa [#allocation9], 0 }
   0x3   :  { %18 = vsyncpa [#allocation4], 0  ;;  %s2599_s13 = smov [#allocation5]  }
   0x4   :  { %s36_s14 = sshll.u32 %s2599_s13, 4  ;;  %s37_s14 = int_to_ptr.vmem [resolvable:$true] %s36_s14 }
   0x5   :  { %s2479_s15 = scalar_lea.vmem %s37_s14, 512  ;;  %p2484_p1 = scmp.lt.s32.totalorder %s37_s14, %s37_s14 }
   0x6   :  { %p2480_p0 = scmp.ne.s32.totalorder %s37_s14, %s2479_s15  ;;  %p2485_p2 = scmp.lt.s32.totalorder %s2479_s15, %s2479_s15 }
   0x8   :  { %p2486_p3 = por %p2485_p2, %p2484_p1 }
   0xa   :  { %p2487_p4 = pnand %p2486_p3, %p2480_p0 }
   0xc   :  { %2490 = shalt.err (!%p2487_p4)
}
   0xd   :  { %s2600_s16 = smov 128   ;;  %s2601_s17 = smov 8  }
   0xe   :  { %42 = dma.hbm_to_vmem [thread:$0]  %s3180_s1, 512, %s37_s14, [#allocation6], %s2600_s16, %s2600_s16, %s2601_s17  }
   0xf   :  { %s2602_s20 = smov [#allocation8]   ;;  %s2603_s22 = smov [#allocation2]  }
  0x10   :  { %s62_s21 = sshll.u32 %s2602_s20, 4  ;;  %s24_s23 = sshll.u32 %s2603_s22, 4  ;;  %s63_s21 = int_to_ptr.vmem [resolvable:$true] %s62_s21  ;;  %s25_s23 = int_to_ptr.vmem [resolvable:$true] %s24_s23 }
  0x11   :  { %s2499_s24 = scalar_lea.vmem %s63_s21, 2048  ;;  %p2504_p6 = scmp.lt.s32.totalorder %s63_s21, %s63_s21 }
  0x12   :  { %p2500_p5 = scmp.ne.s32.totalorder %s63_s21, %s2499_s24  ;;  %p2505_p7 = scmp.lt.s32.totalorder %s2499_s24, %s2499_s24 }
  0x14   :  { %p2506_p8 = por %p2505_p7, %p2504_p6 }
  0x16   :  { %p2507_p9 = pnand %p2506_p8, %p2500_p5 }
  0x18   :  { %2510 = shalt.err (!%p2507_p9)
}
  0x19   :  { %s2604_s25 = smov 64   ;;  %s2605_s26 = smov 4  }
  0x1a   :  { %68 = dma.hbm_to_vmem [thread:$0]  %s3183_s4, 2048, %s63_s21, [#allocation9], %s2604_s25, %s2604_s25, %s2605_s26  }
  0x1b   :  { %s2519_s1 = scalar_lea.vmem %s25_s23, 2048  ;;  %p2524_p11 = scmp.lt.s32.totalorder %s25_s23, %s25_s23 }
  0x1c   :  { %p2520_p10 = scmp.ne.s32.totalorder %s25_s23, %s2519_s1  ;;  %p2525_p12 = scmp.lt.s32.totalorder %s2519_s1, %s2519_s1 }
  0x1e   :  { %p2526_p13 = por %p2525_p12, %p2524_p11 }
  0x20   :  { %p2527_p0 = pnand %p2526_p13, %p2520_p10 }
  0x22   :  { %2530 = shalt.err (!%p2527_p0)
}
  0x23   :  { %30 = dma.hbm_to_vmem [thread:$0]  %s3179_s0, 2048, %s25_s23, [#allocation3], %s2600_s16, %s2600_s16, %s2601_s17  }
  0x24   :  { %s2606_s11 = smov [#allocation7]   ;;  %s2607_s13 = smov [#allocation10]  }
  0x25   :  { %s48_s12 = sshll.u32 %s2606_s11, 4  ;;  %s80_s4 = sshll.u32 %s2607_s13, 4  ;;  %s49_s12 = int_to_ptr.vmem [resolvable:$true] %s48_s12  ;;  %s81_s4 = int_to_ptr.vmem [resolvable:$true] %s80_s4 }
  0x26   :  { %s2539_s14 = scalar_lea.vmem %s49_s12, 2048  ;;  %p2544_p2 = scmp.lt.s32.totalorder %s49_s12, %s49_s12 }
  0x27   :  { %p2540_p1 = scmp.ne.s32.totalorder %s49_s12, %s2539_s14  ;;  %p2545_p3 = scmp.lt.s32.totalorder %s2539_s14, %s2539_s14 }
  0x29   :  { %p2546_p4 = por %p2545_p3, %p2544_p2 }
  0x2b   :  { %p2547_p5 = pnand %p2546_p4, %p2540_p1 }
  0x2d   :  { %2550 = shalt.err (!%p2547_p5)
}
  0x2e   :  { %54 = dma.hbm_to_vmem [thread:$0]  %s3181_s2, 2048, %s49_s12, [#allocation6], %s2604_s25, %s2604_s25, %s2605_s26  }
  0x2f   :  { %s2559_s0 = scalar_lea.vmem %s81_s4, 3072  ;;  %p2564_p7 = scmp.lt.s32.totalorder %s81_s4, %s81_s4 }
  0x30   :  { %p2560_p6 = scmp.ne.s32.totalorder %s81_s4, %s2559_s0  ;;  %p2565_p8 = scmp.lt.s32.totalorder %s2559_s0, %s2559_s0 }
  0x32   :  { %p2566_p9 = por %p2565_p8, %p2564_p7 }
  0x34   :  { %p2567_p10 = pnand %p2566_p9, %p2560_p6 }
  0x36   :  { %2570 = shalt.err (!%p2567_p10)
}
  0x37   :  { %86 = dma.hbm_to_vmem [thread:$0]  %s3187_s8, 3072, %s81_s4, [#allocation9], %s2604_s25, %s2604_s25, %s2605_s26  }
  0x38   :  { %2591 = dma.done.wait [#allocation3], 2048  }
  0x39   :  { %2592 = vsyncadd [#allocation3], 4294965248 }
  0x3a   :  { %2593 = dma.done.wait [#allocation6], 2560  }
  0x3b   :  { %2594 = vsyncadd [#allocation6], 4294964736 }
  0x3c   :  { %2595 = dma.done.wait [#allocation9], 5120  }
  0x3d   :  { %2596 = vsyncadd [#allocation9], 4294962176  ;;  %v2694_v0 = vld [vmem:[#allocation2 + $0x70] sm:$0xff]  ;;  %v2696_v1 = vld [vmem:[#allocation2 + $0x78] sm:$0xff] }
  0x3e   :  { %v2698_v2 = vld [vmem:[#allocation2 + $0x60] sm:$0xff]  ;;  %v2702_v3 = vpack.c.bf16 %v2696_v1, %v2694_v0  ;;  %v2704_v4 = vld [vmem:[#allocation2 + $0x68] sm:$0xff]  ;;  %v2710_v6 = vld [vmem:[#allocation2 + $0x50] sm:$0xff] }
  0x3f   :  { %v2708_v5 = vpack.c.bf16 %v2704_v4, %v2698_v2  ;;  %v2712_v7 = vld [vmem:[#allocation2 + $0x58] sm:$0xff]  ;;  %v2721_v9 = vld [vmem:[#allocation2] sm:$0xff]  ;;  %v2723_v10 = vld [vmem:[#allocation2 + $0x8] sm:$0xff] }
  0x40   :  { %2125 = vmatprep.subr.bf16.mxu1 %v2702_v3  ;;  %v2719_v8 = vpack.c.bf16 %v2712_v7, %v2710_v6  ;;  %v2725_v11 = vld [vmem:[#allocation5] sm:$0xff]  ;;  %v2729_v13 = vld [vmem:[#allocation2 + $0x48] sm:$0xff]  ;;  %v2407_v15 = vld [vmem:[#allocation10 + $0x38] sm:$0xff]   ;;  %v133_v16 = vpack.c.bf16 %v2723_v10, %v2721_v9  ;;  %v406_v60 = vmul.f32 1.05, %v2721_v9 }
  0x41   :  { %2126 = vmatpush3.bf16.msra.mxu1 %v2702_v3  ;;  %v2727_v12 = vld [vmem:[#allocation2 + $0x40] sm:$0xff]  ;;  %v125_v14 = vunpack.c.l.s8.bf16 %v2725_v11  ;;  %v2408_v17 = vld [vmem:[#allocation10 + $0x30] sm:$0xff]   ;;  %2093 = vmatprep.subr.bf16.mxu0 %v2407_v15  ;;  %v2744_v20 = vld [vmem:[#allocation2 + $0x38] sm:$0xff]  ;;  %v126_v35 = vunpack.c.h.s8.bf16 %v2725_v11  ;;  %v407_v61 = vmul.f32 1.05, %v2723_v10 }
  0x42   :  { %2127 = vmatprep.subr.bf16.mxu1 %v2708_v5  ;;  %v2740_v18 = vpack.c.bf16 %v2729_v13, %v2727_v12  ;;  %v2742_v19 = vld [vmem:[#allocation2 + $0x30] sm:$0xff]  ;;  %2094 = vmatpush3.bf16.msra.mxu0 %v2407_v15  ;;  %v2409_v21 = vld [vmem:[#allocation10 + $0x28] sm:$0xff]   ;;  %v2750_v23 = vld [vmem:[#allocation2 + $0x20] sm:$0xff] }
  0x43   :  { %2141 = vmatprep.mubr.bf16.mxu1 %v125_v14  ;;  %2109 = vmatprep.mubr.bf16.mxu0 %v133_v16  ;;  %v136_v22 = vpack.c.bf16 %v2744_v20, %v2742_v19  ;;  %v2752_v24 = vld [vmem:[#allocation2 + $0x28] sm:$0xff]  ;;  %v2410_v25 = vld [vmem:[#allocation10 + $0x20] sm:$0xff]   ;;  %v2757_v27 = vld [vmem:[#allocation2 + $0x10] sm:$0xff] }
  0x44   :  { %2095 = vmatprep.subr.bf16.mxu0 %v2408_v17  ;;  %v135_v26 = vpack.c.bf16 %v2752_v24, %v2750_v23  ;;  %v2759_v28 = vld [vmem:[#allocation2 + $0x18] sm:$0xff]  ;;  %v2412_v31 = vld [vmem:[#allocation10 + $0x10] sm:$0xff]   ;;  %v2413_v32 = vld [vmem:[#allocation10 + $0x8] sm:$0xff]   ;;  %v408_v62 = vmul.f32 1.05, %v2757_v27 }
  0x45   :  { %2128 = vmatpush3.bf16.msra.mxu1 %v2708_v5  ;;  %v2411_v29 = vld [vmem:[#allocation10 + $0x18] sm:$0xff]   ;;  %v134_v30 = vpack.c.bf16 %v2759_v28, %v2757_v27  ;;  %v2763_v33 = vld [vmem:[#allocation5 + $0x8] sm:$0xff]  ;;  %v2414_v34 = vld [vmem:[#allocation10] sm:$0xff]   ;;  %v409_v59 = vmul.f32 1.05, %v2759_v28 }
  0x46   :  { %2129 = vmatprep.subr.bf16.mxu1 %v2719_v8  ;;  %2096 = vmatpush3.bf16.msra.mxu0 %v2408_v17  ;;  %v127_v36 = vunpack.c.l.s8.bf16 %v2763_v33  ;;  %v2415_v37 = vld [vmem:[#allocation7 + $0x38] sm:$0xff]   ;;  %v2769_v38 = vld [vmem:[#allocation5 + $0x10] sm:$0xff]  ;;  %v128_v40 = vunpack.c.h.s8.bf16 %v2763_v33  ;;  %v2417_v42 = vld [vmem:[#allocation7 + $0x28] sm:$0xff]  }
  0x47   :  { %2097 = vmatprep.subr.bf16.mxu0 %v2409_v21  ;;  %v2416_v39 = vld [vmem:[#allocation7 + $0x30] sm:$0xff]   ;;  %v129_v41 = vunpack.c.l.s8.bf16 %v2769_v38  ;;  %v2777_v43 = vld [vmem:[#allocation5 + $0x18] sm:$0xff]  ;;  %v2418_v44 = vld [vmem:[#allocation7 + $0x20] sm:$0xff]   ;;  %v130_v45 = vunpack.c.h.s8.bf16 %v2769_v38 }
  0x48   :  { %v131_v46 = vunpack.c.l.s8.bf16 %v2777_v43  ;;  %v2419_v47 = vld [vmem:[#allocation7 + $0x18] sm:$0xff]   ;;  %v132_v48 = vunpack.c.h.s8.bf16 %v2777_v43  ;;  %v2420_v49 = vld [vmem:[#allocation7 + $0x10] sm:$0xff]   ;;  %v2421_v50 = vld [vmem:[#allocation7 + $0x8] sm:$0xff]  }
  0x49   :  { %2130 = vmatpush3.bf16.msra.mxu1 %v2719_v8  ;;  %v2422_v51 = vld [vmem:[#allocation7] sm:$0xff]   ;;  %v2423_v52 = vld [vmem:[#allocation8 + $0x38] sm:$0xff]   ;;  %v2424_v53 = vld [vmem:[#allocation8 + $0x30] sm:$0xff]  }
  0x4a   :  { %2131 = vmatprep.subr.bf16.mxu1 %v2740_v18  ;;  %2098 = vmatpush3.bf16.msra.mxu0 %v2409_v21  ;;  %v2425_v54 = vld [vmem:[#allocation8 + $0x28] sm:$0xff]   ;;  %v2426_v55 = vld [vmem:[#allocation8 + $0x20] sm:$0xff]   ;;  %v2427_v56 = vld [vmem:[#allocation8 + $0x18] sm:$0xff]  }
  0x4b   :  { %2099 = vmatprep.subr.bf16.mxu0 %v2410_v25  ;;  %v2439_v11 = vld [vmem:[#allocation7 + $0x78] sm:$0xff]   ;;  %v2442_v33 = vld [vmem:[#allocation7 + $0x60] sm:$0xff]   ;;  %v2444_v38 = vld [vmem:[#allocation7 + $0x50] sm:$0xff]  }
  0x4c   :  { %v2446_v43 = vld [vmem:[#allocation7 + $0x40] sm:$0xff]  }
  0x4d   :  { %2132 = vmatpush3.bf16.msra.mxu1 %v2740_v18 }
  0x4e   :  { %2133 = vmatprep.subr.bf16.mxu1 %v136_v22  ;;  %2100 = vmatpush3.bf16.msra.mxu0 %v2410_v25  ;;  %v413_v25 = vmul.f32 1.05, %v2744_v20 }
  0x4f   :  { %2101 = vmatprep.subr.bf16.mxu0 %v2411_v29 }
  0x51   :  { %2134 = vmatpush3.bf16.msra.mxu1 %v136_v22 }
  0x52   :  { %2135 = vmatprep.subr.bf16.mxu1 %v135_v26  ;;  %2102 = vmatpush3.bf16.msra.mxu0 %v2411_v29  ;;  %v411_v29 = vmul.f32 1.05, %v2752_v24 }
  0x53   :  { %2103 = vmatprep.subr.bf16.mxu0 %v2412_v31 }
  0x55   :  { %2136 = vmatpush3.bf16.msra.mxu1 %v135_v26 }
  0x56   :  { %2137 = vmatprep.subr.bf16.mxu1 %v134_v30  ;;  %2104 = vmatpush3.bf16.msra.mxu0 %v2412_v31 }
  0x57   :  { %2105 = vmatprep.subr.bf16.mxu0 %v2413_v32 }
  0x59   :  { %2138 = vmatpush3.bf16.msra.mxu1 %v134_v30 }
  0x5a   :  { %2139 = vmatprep.subr.bf16.mxu1 %v133_v16  ;;  %2106 = vmatpush3.bf16.msra.mxu0 %v2413_v32 }
  0x5b   :  { %2107 = vmatprep.subr.bf16.mxu0 %v2414_v34 }
  0x5d   :  { %2140 = vmatpush3.bf16.msra.mxu1 %v133_v16 }
  0x5e   :  { %2108 = vmatpush3.bf16.msra.mxu0 %v2414_v34  ;;  %2189 = vmatprep.subr.bf16.mxu1 %v2423_v52 }
  0x5f   :  { %2157 = vmatprep.subr.bf16.mxu0 %v2415_v37 }
  0x60   :  { %2142 = vmatmul.mubr.bf16.vlgmr.msra.gmra.mxu1 %v126_v35 }
  0x61   :  { %2145 = vmatprep.mubr.bf16.mxu1 %v127_v36  ;;  %2110 = vmatmul.mubr.bf16.vlgmr.msra.gmra.mxu0 %v134_v30  ;;  %v412_v30 = vmul.f32 1.05, %v2742_v19 }
  0x62   :  { %2113 = vmatprep.mubr.bf16.mxu0 %v135_v26  ;;  %2158 = vmatpush3.bf16.msra.mxu0 %v2415_v37  ;;  %v410_v26 = vmul.f32 1.05, %v2750_v23 }
  0x63   :  { %2159 = vmatprep.subr.bf16.mxu0 %v2416_v39  ;;  %2190 = vmatpush3.bf16.msra.mxu1 %v2423_v52  ;;  %v414_v52 = vmul.f32 1.05, %v2727_v12  ;;  %v418_v12 = vmul.f32 1.05, %v2698_v2  ;;  %v2430_v2 = vld [vmem:[#allocation8] sm:$0xff]  }
  0x64   :  { %2191 = vmatprep.subr.bf16.mxu1 %v2424_v53 }
  0x66   :  { %2160 = vmatpush3.bf16.msra.mxu0 %v2416_v39 }
  0x67   :  { %2161 = vmatprep.subr.bf16.mxu0 %v2417_v42  ;;  %2192 = vmatpush3.bf16.msra.mxu1 %v2424_v53  ;;  %v415_v53 = vmul.f32 1.05, %v2729_v13  ;;  %v419_v13 = vmul.f32 1.05, %v2704_v4  ;;  %v2432_v4 = vld [vmem:[#allocation10 + $0x70] sm:$0xff]  }
  0x68   :  { %2146 = vmatmul.mubr.bf16.gmra.mxu1 %v128_v40  ;;  %2193 = vmatprep.subr.bf16.mxu1 %v2425_v54 }
  0x69   :  { %2149 = vmatprep.mubr.bf16.mxu1 %v129_v41  ;;  %2114 = vmatmul.mubr.bf16.gmra.mxu0 %v136_v22 }
  0x6a   :  { %2117 = vmatprep.mubr.bf16.mxu0 %v2740_v18  ;;  %2162 = vmatpush3.bf16.msra.mxu0 %v2417_v42 }
  0x6b   :  { %2163 = vmatprep.subr.bf16.mxu0 %v2418_v44  ;;  %2194 = vmatpush3.bf16.msra.mxu1 %v2425_v54  ;;  %v416_v54 = vmul.f32 1.05, %v2710_v6  ;;  %v420_v6 = vmul.f32 1.05, %v2694_v0  ;;  %v2431_v0 = vld [vmem:[#allocation10 + $0x78] sm:$0xff]  }
  0x6c   :  { %2195 = vmatprep.subr.bf16.mxu1 %v2426_v55 }
  0x6e   :  { %2164 = vmatpush3.bf16.msra.mxu0 %v2418_v44 }
  0x6f   :  { %2165 = vmatprep.subr.bf16.mxu0 %v2419_v47  ;;  %2196 = vmatpush3.bf16.msra.mxu1 %v2426_v55 }
  0x70   :  { %2150 = vmatmul.mubr.bf16.gmra.mxu1 %v130_v45  ;;  %2197 = vmatprep.subr.bf16.mxu1 %v2427_v56 }
  0x71   :  { %2153 = vmatprep.mubr.bf16.mxu1 %v131_v46  ;;  %2118 = vmatmul.mubr.bf16.gmra.mxu0 %v2719_v8 }
  0x72   :  { %2121 = vmatprep.mubr.bf16.mxu0 %v2708_v5  ;;  %2166 = vmatpush3.bf16.msra.mxu0 %v2419_v47 }
  0x73   :  { %2167 = vmatprep.subr.bf16.mxu0 %v2420_v49  ;;  %2198 = vmatpush3.bf16.msra.mxu1 %v2427_v56 }
  0x76   :  { %2168 = vmatpush3.bf16.msra.mxu0 %v2420_v49 }
  0x77   :  { %2169 = vmatprep.subr.bf16.mxu0 %v2421_v50 }
  0x78   :  { %2154 = vmatmul.mubr.bf16.gmra.mxu1 %v132_v48 }
  0x79   :  { %2122 = vmatmul.mubr.bf16.gmra.mxu0 %v2702_v3 }
  0x7a   :  { %2170 = vmatpush3.bf16.msra.mxu0 %v2421_v50 }
  0x7b   :  { %2171 = vmatprep.subr.bf16.mxu0 %v2422_v51 }
  0x7e   :  { %2172 = vmatpush3.bf16.msra.mxu0 %v2422_v51  ;;  %v417_v51 = vmul.f32 1.05, %v2712_v7  ;;  %v421_v7 = vmul.f32 1.05, %v2696_v1  ;;  %v2429_v1 = vld [vmem:[#allocation8 + $0x8] sm:$0xff]  }
  0x7f   :  { %2221 = vmatprep.subr.bf16.mxu0 %v2431_v0 }
 0x120   :  { %v2143_v57 = vpop.f32.mrf.mxu1 }
 0x121   :  { %v424_v16 = vadd.f32 %v2143_v57, %v408_v62 }
 0x122   :  { %v343_v58 = vpop.f32.mrf.mxu1 }
 0x123   :  { %v422_v8 = vadd.f32 %v406_v60, %v343_v58 }
 0x124   :  { %v2144_v63 = vpop.f32.mrf.mxu1 }
 0x125   :  { %v425_v3 = vadd.f32 %v2144_v63, %v409_v59 }
 0x126   :  { %v346_v5 = vpop.f32.mrf.mxu1 }
 0x127   :  { %v423_v15 = vadd.f32 %v407_v61, %v346_v5  ;;  %v439_v21 = vpack.c.bf16 %v425_v3, %v424_v16 }
 0x128   :  { %v2147_v17 = vpop.f32.mrf.mxu1 }
 0x129   :  { %v438_v18 = vpack.c.bf16 %v423_v15, %v422_v8  ;;  %v428_v42 = vadd.f32 %v2147_v17, %v412_v30 }
 0x12a   :  { %v359_v22 = vpop.f32.mrf.mxu1 }
 0x12b   :  { %2173 = vmatprep.mubr.bf16.mxu0 %v438_v18  ;;  %v426_v37 = vadd.f32 %v410_v26, %v359_v22  ;;  %v2433_v26 = vld [vmem:[#allocation10 + $0x68] sm:$0xff]  }
 0x12c   :  { %v2148_v31 = vpop.f32.mrf.mxu1  ;;  %2174 = vmatmul.mubr.bf16.vlgmr.msra.gmra.mxu0 %v439_v21 }
 0x12d   :  { %v429_v32 = vadd.f32 %v2148_v31, %v413_v25  ;;  %v2428_v25 = vld [vmem:[#allocation8 + $0x10] sm:$0xff]   ;;  %2222 = vmatpush3.bf16.msra.mxu0 %v2431_v0 }
 0x12e   :  { %v362_v34 = vpop.f32.mrf.mxu1  ;;  %2199 = vmatprep.subr.bf16.mxu1 %v2428_v25  ;;  %2223 = vmatprep.subr.bf16.mxu0 %v2432_v4 }
 0x12f   :  { %v427_v39 = vadd.f32 %v411_v29, %v362_v34  ;;  %v441_v49 = vpack.c.bf16 %v429_v32, %v428_v42  ;;  %2200 = vmatpush3.bf16.msra.mxu1 %v2428_v25  ;;  %v2810_v29 = vpop.f32.mrf.mxu0 }
 0x130   :  { %v2151_v44 = vpop.f32.mrf.mxu1  ;;  %2201 = vmatprep.subr.bf16.mxu1 %v2429_v1 }
 0x131   :  { %v440_v47 = vpack.c.bf16 %v427_v39, %v426_v37  ;;  %v432_v60 = vadd.f32 %v2151_v44, %v416_v54  ;;  %2224 = vmatpush3.bf16.msra.mxu0 %v2432_v4  ;;  %v2812_v30 = vpop.f32.mrf.mxu0 }
 0x132   :  { %v375_v50 = vpop.f32.mrf.mxu1  ;;  %2225 = vmatprep.subr.bf16.mxu0 %v2433_v26 }
 0x133   :  { %2177 = vmatprep.mubr.bf16.mxu0 %v440_v47  ;;  %v430_v58 = vadd.f32 %v414_v52, %v375_v50  ;;  %2202 = vmatpush3.bf16.msra.mxu1 %v2429_v1  ;;  %v2814_v31 = vpop.f32.mrf.mxu0 }
 0x134   :  { %v2152_v55 = vpop.f32.mrf.mxu1  ;;  %2178 = vmatmul.mubr.bf16.gmra.mxu0 %v441_v49  ;;  %2203 = vmatprep.subr.bf16.mxu1 %v2430_v2 }
 0x135   :  { %v433_v56 = vadd.f32 %v2152_v55, %v417_v51  ;;  %2226 = vmatpush3.bf16.msra.mxu0 %v2433_v26  ;;  %v2816_v32 = vpop.f32.mrf.mxu0 }
 0x136   :  { %v378_v57 = vpop.f32.mrf.mxu1 }
 0x137   :  { %v431_v59 = vadd.f32 %v415_v53, %v378_v57  ;;  %v443_v63 = vpack.c.bf16 %v433_v56, %v432_v60  ;;  %2204 = vmatpush3.bf16.msra.mxu1 %v2430_v2  ;;  %v2818_v34 = vpop.f32.mrf.mxu0  ;;  %v1893_v57 = vld [vmem:[%s3182_s3] ss:$0 sm:$0xff] }
 0x138   :  { %v2155_v61 = vpop.f32.mrf.mxu1 }
 0x139   :  { %v442_v62 = vpack.c.bf16 %v431_v59, %v430_v58  ;;  %v436_v18 = vadd.f32 %v2155_v61, %v420_v6  ;;  %v2820_v37 = vpop.f32.mrf.mxu0 }
 0x13a   :  { %v391_v3 = vpop.f32.mrf.mxu1 }
 0x13b   :  { %2181 = vmatprep.mubr.bf16.mxu0 %v442_v62  ;;  %v434_v16 = vadd.f32 %v418_v12, %v391_v3  ;;  %v2822_v39 = vpop.f32.mrf.mxu0 }
 0x13c   :  { %v2156_v5 = vpop.f32.mrf.mxu1  ;;  %2182 = vmatmul.mubr.bf16.gmra.mxu0 %v443_v63 }
 0x13d   :  { %v437_v8 = vadd.f32 %v2156_v5, %v421_v7  ;;  %v2824_v42 = vpop.f32.mrf.mxu0 }
 0x13e   :  { %v394_v15 = vpop.f32.mrf.mxu1 }
 0x13f   :  { %v435_v17 = vadd.f32 %v419_v13, %v394_v15  ;;  %v445_v22 = vpack.c.bf16 %v437_v8, %v436_v18  ;;  %v2826_v44 = vpop.f32.mrf.mxu0 }
 0x141   :  { %v444_v21 = vpack.c.bf16 %v435_v17, %v434_v16  ;;  %v2828_v47 = vpop.f32.mrf.mxu0 }
 0x143   :  { %2185 = vmatprep.mubr.bf16.mxu0 %v444_v21  ;;  %v2830_v49 = vpop.f32.mrf.mxu0 }
 0x144   :  { %2186 = vmatmul.mubr.bf16.gmra.mxu0 %v445_v22 }
 0x145   :  { %v2832_v50 = vpop.f32.mrf.mxu0 }
 0x147   :  { %v2834_v51 = vpop.f32.mrf.mxu0 }
 0x149   :  { %v2836_v52 = vpop.f32.mrf.mxu0 }
 0x14b   :  { %v2838_v53 = vpop.f32.mrf.mxu0 }
 0x14d   :  { %v2840_v54 = vpop.f32.mrf.mxu0 }
 0x1ec   :  { %v2175_v55 = vpop.f32.mrf.mxu0 }
 0x1ed   :  { %v558_v61 = vadd.f32 %v2175_v55, %v1893_v57 }
 0x1ee   :  { %v549_v56 = vpop.f32.mrf.mxu0 }
 0x1ef   :  { %v550_v59 = vadd.f32 %v1893_v57, %v549_v56  ;;  %v614_v6 = vmax.f32 %v558_v61, 0.0 }
 0x1f0   :  { %v2176_v58 = vpop.f32.mrf.mxu0 }
 0x1f1   :  { %v561_v60 = vadd.f32 %v2176_v58, %v1893_v57  ;;  %v612_v12 = vmax.f32 %v550_v59, 0.0 }
 0x1f2   :  { %v552_v62 = vpop.f32.mrf.mxu0 }
 0x1f3   :  { %v553_v63 = vadd.f32 %v1893_v57, %v552_v62  ;;  %v615_v3 = vmax.f32 %v561_v60, 0.0 }
 0x1f4   :  { %v2179_v7 = vpop.f32.mrf.mxu0 }
 0x1f5   :  { %v613_v13 = vmax.f32 %v553_v63, 0.0  ;;  %v629_v15 = vpack.c.bf16 %v615_v3, %v614_v6  ;;  %v574_v21 = vadd.f32 %v2179_v7, %v1893_v57 }
 0x1f6   :  { %v565_v5 = vpop.f32.mrf.mxu0 }
 0x1f7   :  { %v628_v8 = vpack.c.bf16 %v613_v13, %v612_v12  ;;  %v566_v17 = vadd.f32 %v1893_v57, %v565_v5  ;;  %v618_v26 = vmax.f32 %v574_v21, 0.0 }
 0x1f8   :  { %v2180_v16 = vpop.f32.mrf.mxu0 }
 0x1f9   :  { %v577_v18 = vadd.f32 %v2180_v16, %v1893_v57  ;;  %2205 = vmatprep.mubr.bf16.mxu1 %v628_v8  ;;  %v616_v0 = vmax.f32 %v566_v17, 0.0 }
 0x1fa   :  { %v568_v22 = vpop.f32.mrf.mxu0  ;;  %2206 = vmatmul.mubr.bf16.vlgmr.msra.gmra.mxu1 %v629_v15 }
 0x1fb   :  { %v569_v25 = vadd.f32 %v1893_v57, %v568_v22  ;;  %v619_v1 = vmax.f32 %v577_v18, 0.0 }
 0x1fc   :  { %v2183_v2 = vpop.f32.mrf.mxu0 }
 0x1fd   :  { %v617_v4 = vmax.f32 %v569_v25, 0.0  ;;  %v631_v58 = vpack.c.bf16 %v619_v1, %v618_v26  ;;  %v590_v62 = vadd.f32 %v2183_v2, %v1893_v57 }
 0x1fe   :  { %v581_v55 = vpop.f32.mrf.mxu0 }
 0x1ff   :  { %v630_v56 = vpack.c.bf16 %v617_v4, %v616_v0  ;;  %v582_v60 = vadd.f32 %v1893_v57, %v581_v55  ;;  %v622_v5 = vmax.f32 %v590_v62, 0.0  ;;  %v2850_v62 = vld [vmem:[%s3184_s5] ss:$0 sm:$0xff] }
 0x200   :  { %v2184_v59 = vpop.f32.mrf.mxu0 }
 0x201   :  { %v593_v61 = vadd.f32 %v2184_v59, %v1893_v57  ;;  %2209 = vmatprep.mubr.bf16.mxu1 %v630_v56  ;;  %v620_v13 = vmax.f32 %v582_v60, 0.0  ;;  %v2435_v59 = vld [vmem:[#allocation10 + $0x58] sm:$0xff]   ;;  %v2436_v60 = vld [vmem:[#allocation10 + $0x50] sm:$0xff]  }
 0x202   :  { %v584_v63 = vpop.f32.mrf.mxu0  ;;  %2210 = vmatmul.mubr.bf16.gmra.mxu1 %v631_v58  ;;  %v2434_v58 = vld [vmem:[#allocation10 + $0x60] sm:$0xff]  }
 0x203   :  { %v585_v3 = vadd.f32 %v1893_v57, %v584_v63  ;;  %v623_v7 = vmax.f32 %v593_v61, 0.0  ;;  %2227 = vmatprep.subr.bf16.mxu0 %v2434_v58  ;;  %v2438_v61 = vld [vmem:[#allocation10 + $0x40] sm:$0xff]  }
 0x204   :  { %v2187_v12 = vpop.f32.mrf.mxu0  ;;  %2228 = vmatpush3.bf16.msra.mxu0 %v2434_v58 }
 0x205   :  { %v621_v6 = vmax.f32 %v585_v3, 0.0  ;;  %v633_v16 = vpack.c.bf16 %v623_v7, %v622_v5  ;;  %v606_v22 = vadd.f32 %v2187_v12, %v1893_v57  ;;  %2229 = vmatprep.subr.bf16.mxu0 %v2435_v59  ;;  %v2856_v12 = vld [vmem:[%s3185_s6] ss:$0 sm:$0xff] }
 0x206   :  { %v597_v8 = vpop.f32.mrf.mxu0 }
 0x207   :  { %v632_v15 = vpack.c.bf16 %v621_v6, %v620_v13  ;;  %v598_v18 = vadd.f32 %v1893_v57, %v597_v8  ;;  %v626_v26 = vmax.f32 %v606_v22, 0.0 }
 0x208   :  { %v2188_v17 = vpop.f32.mrf.mxu0  ;;  %2230 = vmatpush3.bf16.msra.mxu0 %v2435_v59 }
 0x209   :  { %v609_v21 = vadd.f32 %v2188_v17, %v1893_v57  ;;  %2213 = vmatprep.mubr.bf16.mxu1 %v632_v15  ;;  %v624_v0 = vmax.f32 %v598_v18, 0.0  ;;  %2231 = vmatprep.subr.bf16.mxu0 %v2436_v60  ;;  %v2864_v17 = vld [vmem:[%s3186_s7] ss:$0 sm:$0xff] }
 0x20a   :  { %v600_v25 = vpop.f32.mrf.mxu0  ;;  %2214 = vmatmul.mubr.bf16.gmra.mxu1 %v633_v16 }
 0x20b   :  { %v601_v1 = vadd.f32 %v1893_v57, %v600_v25  ;;  %v627_v2 = vmax.f32 %v609_v21, 0.0  ;;  %v2437_v57 = vld [vmem:[#allocation10 + $0x48] sm:$0xff]  }
 0x20c   :  { %2232 = vmatpush3.bf16.msra.mxu0 %v2436_v60 }
 0x20d   :  { %v625_v4 = vmax.f32 %v601_v1, 0.0  ;;  %v635_v56 = vpack.c.bf16 %v627_v2, %v626_v26  ;;  %2233 = vmatprep.subr.bf16.mxu0 %v2437_v57 }
 0x20f   :  { %v634_v55 = vpack.c.bf16 %v625_v4, %v624_v0 }
 0x210   :  { %2234 = vmatpush3.bf16.msra.mxu0 %v2437_v57 }
 0x211   :  { %2217 = vmatprep.mubr.bf16.mxu1 %v634_v55  ;;  %2235 = vmatprep.subr.bf16.mxu0 %v2438_v61 }
 0x212   :  { %2218 = vmatmul.mubr.bf16.gmra.mxu1 %v635_v56 }
 0x213   :  { %2269 = vmatprep.mubr.bf16.mxu1 %v125_v14 }
 0x214   :  { %2236 = vmatpush3.bf16.msra.mxu0 %v2438_v61 }
 0x215   :  { %2285 = vmatprep.subr.bf16.mxu0 %v2439_v11 }
 0x2ba   :  { %v2207_v14 = vpop.f32.mrf.mxu1 }
 0x2bb   :  { %v748_v63 = vadd.f32 %v2207_v14, %v2850_v62 }
 0x2bc   :  { %v739_v3 = vpop.f32.mrf.mxu1 }
 0x2bd   :  { %v804_v7 = vmax.f32 %v748_v63, 0.0  ;;  %v740_v13 = vadd.f32 %v2850_v62, %v739_v3 }
 0x2be   :  { %v2208_v6 = vpop.f32.mrf.mxu1 }
 0x2bf   :  { %v802_v5 = vmax.f32 %v740_v13, 0.0  ;;  %v751_v8 = vadd.f32 %v2208_v6, %v2850_v62  ;;  %v825_v15 = vmul.f32 %v2856_v12, %v804_v7 }
 0x2c0   :  { %v742_v16 = vpop.f32.mrf.mxu1 }
 0x2c1   :  { %v823_v18 = vmul.f32 %v2856_v12, %v802_v5  ;;  %v805_v21 = vmax.f32 %v751_v8, 0.0  ;;  %v743_v22 = vadd.f32 %v2850_v62, %v742_v16  ;;  %v846_v0 = vadd.f32 %v2864_v17, %v825_v15 }
 0x2c2   :  { %v2211_v25 = vpop.f32.mrf.mxu1 }
 0x2c3   :  { %v826_v1 = vmul.f32 %v2856_v12, %v805_v21  ;;  %v803_v2 = vmax.f32 %v743_v22, 0.0  ;;  %v844_v4 = vadd.f32 %v2864_v17, %v823_v18  ;;  %v764_v26 = vadd.f32 %v2211_v25, %v2850_v62 }
 0x2c4   :  { %v755_v55 = vpop.f32.mrf.mxu1  ;;  %v862_v3 = vmax.f32 %v846_v0, 0.0 }
 0x2c5   :  { %v847_v56 = vadd.f32 %v2864_v17, %v826_v1  ;;  %v824_v58 = vmul.f32 %v2856_v12, %v803_v2  ;;  %v808_v59 = vmax.f32 %v764_v26, 0.0  ;;  %v756_v60 = vadd.f32 %v2850_v62, %v755_v55 }
 0x2c6   :  { %v2212_v57 = vpop.f32.mrf.mxu1  ;;  %v860_v7 = vmax.f32 %v844_v4, 0.0  ;;  %v2889_v4 = vadd.f32 %v862_v3, %v2757_v27 }
 0x2c7   :  { %v863_v61 = vmax.f32 %v847_v56, 0.0  ;;  %v845_v14 = vadd.f32 %v2864_v17, %v824_v58  ;;  %v767_v63 = vadd.f32 %v2212_v57, %v2850_v62  ;;  %v829_v13 = vmul.f32 %v2856_v12, %v808_v59 }
 0x2c8   :  { %v806_v6 = vmax.f32 %v756_v60, 0.0  ;;  %v758_v5 = vpop.f32.mrf.mxu1  ;;  %v2892_v26 = vadd.f32 %v860_v7, %v2721_v9 }
 0x2c9   :  { %v861_v8 = vmax.f32 %v845_v14, 0.0  ;;  %v809_v15 = vmax.f32 %v767_v63, 0.0  ;;  %v759_v16 = vadd.f32 %v2850_v62, %v758_v5  ;;  %v2880_v18 = vadd.f32 %v863_v61, %v2759_v28 }
 0x2ca   :  { %v827_v21 = vmul.f32 %v2856_v12, %v806_v6  ;;  %v2215_v22 = vpop.f32.mrf.mxu1  ;;  %v850_v28 = vadd.f32 %v2864_v17, %v829_v13 }
 0x2cb   :  { %v2884_v25 = vadd.f32 %v861_v8, %v2723_v10  ;;  %v830_v1 = vmul.f32 %v2856_v12, %v809_v15  ;;  %v807_v2 = vmax.f32 %v759_v16, 0.0  ;;  %v780_v0 = vadd.f32 %v2215_v22, %v2850_v62 }
 0x2cc   :  { %v848_v55 = vadd.f32 %v2864_v17, %v827_v21  ;;  %v771_v56 = vpop.f32.mrf.mxu1  ;;  %v2905_v9 = vpack.c.bf16 %v2880_v18, %v2889_v4  ;;  %v866_v5 = vmax.f32 %v850_v28, 0.0 }
 0x2cd   :  { %v851_v58 = vadd.f32 %v2864_v17, %v830_v1  ;;  %v828_v10 = vmul.f32 %v2856_v12, %v807_v2  ;;  %v812_v59 = vmax.f32 %v780_v0, 0.0  ;;  %v772_v60 = vadd.f32 %v2850_v62, %v771_v56 }
 0x2ce   :  { %v2216_v57 = vpop.f32.mrf.mxu1  ;;  %v2901_v27 = vpack.c.bf16 %v2884_v25, %v2892_v26  ;;  %v864_v61 = vmax.f32 %v848_v55, 0.0 }
 0x2cf   :  { %v867_v14 = vmax.f32 %v851_v58, 0.0  ;;  %v849_v63 = vadd.f32 %v2864_v17, %v828_v10  ;;  %v810_v3 = vmax.f32 %v772_v60, 0.0  ;;  %v833_v7 = vmul.f32 %v2856_v12, %v812_v59 }
 0x2d0   :  { %v783_v13 = vadd.f32 %v2216_v57, %v2850_v62  ;;  %2237 = vmatprep.mubr.bf16.mxu0 %v2901_v27  ;;  %v774_v6 = vpop.f32.mrf.mxu1  ;;  %v2915_v1 = vadd.f32 %v864_v61, %v2750_v23  ;;  %v2928_v60 = vadd.f32 %v866_v5, %v2742_v19 }
 0x2d1   :  { %v865_v8 = vmax.f32 %v849_v63, 0.0  ;;  %v831_v15 = vmul.f32 %v2856_v12, %v810_v3  ;;  %2238 = vmatmul.mubr.bf16.vlgmr.msra.gmra.mxu0 %v2905_v9  ;;  %v775_v21 = vadd.f32 %v2850_v62, %v774_v6  ;;  %v2918_v2 = vadd.f32 %v867_v14, %v2744_v20 }
 0x2d2   :  { %v813_v16 = vmax.f32 %v783_v13, 0.0  ;;  %v2219_v22 = vpop.f32.mrf.mxu1  ;;  %v854_v55 = vadd.f32 %v2864_v17, %v833_v7  ;;  %2286 = vmatpush3.bf16.msra.mxu0 %v2439_v11 }
 0x2d3   :  { %v2921_v0 = vadd.f32 %v865_v8, %v2752_v24  ;;  %v796_v28 = vadd.f32 %v2219_v22, %v2850_v62  ;;  %v852_v56 = vadd.f32 %v2864_v17, %v831_v15  ;;  %v811_v10 = vmax.f32 %v775_v21, 0.0 }
 0x2d4   :  { %v834_v58 = vmul.f32 %v2856_v12, %v813_v16  ;;  %v787_v59 = vpop.f32.mrf.mxu1  ;;  %v895_v19 = vpack.c.bf16 %v2918_v2, %v2928_v60  ;;  %v870_v13 = vmax.f32 %v854_v55, 0.0 }
 0x2d5   :  { %v816_v23 = vmax.f32 %v796_v28, 0.0  ;;  %v788_v20 = vadd.f32 %v2850_v62, %v787_v59  ;;  %v832_v24 = vmul.f32 %v2856_v12, %v811_v10  ;;  %v894_v14 = vpack.c.bf16 %v2921_v0, %v2915_v1  ;;  %v2463_v10 = vld [vmem:[#allocation2 + $0x58] sm:$0xff] }
 0x2d6   :  { %v855_v57 = vadd.f32 %v2864_v17, %v834_v58  ;;  %v2220_v61 = vpop.f32.mrf.mxu1  ;;  %v868_v6 = vmax.f32 %v852_v56, 0.0 }
 0x2d7   :  { %v837_v63 = vmul.f32 %v2856_v12, %v816_v23  ;;  %v814_v3 = vmax.f32 %v788_v20, 0.0  ;;  %v799_v7 = vadd.f32 %v2220_v61, %v2850_v62  ;;  %v853_v8 = vadd.f32 %v2864_v17, %v832_v24  ;;  %2241 = vmatprep.mubr.bf16.mxu0 %v894_v14  ;;  %v2464_v20 = vld [vmem:[#allocation2 + $0x40] sm:$0xff]  ;;  %v2465_v24 = vld [vmem:[#allocation2 + $0x48] sm:$0xff] }
 0x2d8   :  { %v871_v5 = vmax.f32 %v855_v57, 0.0  ;;  %v790_v15 = vpop.f32.mrf.mxu1  ;;  %v2947_v57 = vadd.f32 %v2464_v20, %v868_v6 }
 0x2d9   :  { %v858_v16 = vadd.f32 %v2864_v17, %v837_v63  ;;  %v835_v21 = vmul.f32 %v2856_v12, %v814_v3  ;;  %v817_v22 = vmax.f32 %v799_v7, 0.0  ;;  %v791_v28 = vadd.f32 %v2850_v62, %v790_v15  ;;  %2242 = vmatmul.mubr.bf16.gmra.mxu0 %v895_v19  ;;  %v2466_v63 = vld [vmem:[#allocation2 + $0x50] sm:$0xff] }
 0x2da   :  { %v869_v58 = vmax.f32 %v853_v8, 0.0  ;;  %v2943_v59 = vadd.f32 %v2463_v10, %v871_v5  ;;  %v2951_v3 = vadd.f32 %v2466_v63, %v870_v13  ;;  %v2468_v13 = vld [vmem:[#allocation2 + $0x78] sm:$0xff] }
 0x2db   :  { %v856_v55 = vadd.f32 %v2864_v17, %v835_v21  ;;  %v838_v56 = vmul.f32 %v2856_v12, %v817_v22  ;;  %v815_v23 = vmax.f32 %v791_v28, 0.0  ;;  %v874_v62 = vmax.f32 %v858_v16, 0.0  ;;  %v2467_v28 = vld [vmem:[#allocation2 + $0x70] sm:$0xff] }
 0x2dc   :  { %v2949_v61 = vadd.f32 %v2465_v24, %v869_v58  ;;  %v897_v6 = vpack.c.bf16 %v2943_v59, %v2951_v3 }
 0x2dd   :  { %v859_v7 = vadd.f32 %v2864_v17, %v838_v56  ;;  %v836_v5 = vmul.f32 %v2856_v12, %v815_v23  ;;  %v872_v15 = vmax.f32 %v856_v55, 0.0  ;;  %v2960_v58 = vadd.f32 %v2467_v28, %v874_v62  ;;  %v2469_v12 = vld [vmem:[#allocation2 + $0x60] sm:$0xff]  ;;  %v2470_v23 = vld [vmem:[#allocation2 + $0x68] sm:$0xff] }
 0x2de   :  { %v896_v8 = vpack.c.bf16 %v2949_v61, %v2947_v57 }
 0x2df   :  { %v875_v21 = vmax.f32 %v859_v7, 0.0  ;;  %v857_v22 = vadd.f32 %v2864_v17, %v836_v5  ;;  %v2964_v56 = vadd.f32 %v2469_v12, %v872_v15 }
 0x2e0   :  { %2245 = vmatprep.mubr.bf16.mxu0 %v896_v8 }
 0x2e1   :  { %v2962_v16 = vadd.f32 %v2468_v13, %v875_v21  ;;  %v873_v10 = vmax.f32 %v857_v22, 0.0  ;;  %2246 = vmatmul.mubr.bf16.gmra.mxu0 %v897_v6 }
 0x2e3   :  { %v2966_v55 = vadd.f32 %v2470_v23, %v873_v10  ;;  %v899_v17 = vpack.c.bf16 %v2962_v16, %v2960_v58 }
 0x2e5   :  { %2253 = vmatprep.subr.bf16.mxu1 %v899_v17  ;;  %v898_v20 = vpack.c.bf16 %v2966_v55, %v2964_v56 }
 0x2e6   :  { %2254 = vmatpush3.bf16.msra.mxu1 %v899_v17 }
 0x2e7   :  { %2249 = vmatprep.mubr.bf16.mxu0 %v898_v20  ;;  %2255 = vmatprep.subr.bf16.mxu1 %v898_v20 }
 0x2e9   :  { %2250 = vmatmul.mubr.bf16.gmra.mxu0 %v899_v17 }
 0x2ea   :  { %2256 = vmatpush3.bf16.msra.mxu1 %v898_v20 }
 0x2eb   :  { %2257 = vmatprep.subr.bf16.mxu1 %v897_v6 }
 0x2ee   :  { %2258 = vmatpush3.bf16.msra.mxu1 %v897_v6 }
 0x2ef   :  { %2259 = vmatprep.subr.bf16.mxu1 %v896_v8 }
 0x2f2   :  { %2260 = vmatpush3.bf16.msra.mxu1 %v896_v8 }
 0x2f3   :  { %2261 = vmatprep.subr.bf16.mxu1 %v895_v19 }
 0x2f6   :  { %2262 = vmatpush3.bf16.msra.mxu1 %v895_v19 }
 0x2f7   :  { %2263 = vmatprep.subr.bf16.mxu1 %v894_v14 }
 0x2fa   :  { %2264 = vmatpush3.bf16.msra.mxu1 %v894_v14  ;;  %v2993_v14 = vld [vmem:[%s3188_s9] ss:$0 sm:$0xff] }
 0x2fb   :  { %2265 = vmatprep.subr.bf16.mxu1 %v2905_v9  ;;  %v255_v19 = vadd.f32 %v2810_v29, %v2993_v14  ;;  %v247_v63 = vadd.f32 %v2993_v14, %v2812_v30  ;;  %v258_v5 = vadd.f32 %v2814_v31, %v2993_v14  ;;  %v250_v21 = vadd.f32 %v2993_v14, %v2816_v32 }
 0x2fc   :  { %v271_v29 = vadd.f32 %v2818_v34, %v2993_v14  ;;  %v263_v13 = vadd.f32 %v2993_v14, %v2820_v37  ;;  %v274_v12 = vadd.f32 %v2822_v39, %v2993_v14  ;;  %v266_v17 = vadd.f32 %v2993_v14, %v2824_v42 }
 0x2fd   :  { %v287_v11 = vadd.f32 %v2826_v44, %v2993_v14 }
 0x2fe   :  { %2266 = vmatpush3.bf16.msra.mxu1 %v2905_v9  ;;  %v2451_v9 = vld [vmem:[#allocation8 + $0x58] sm:$0xff]  }
 0x2ff   :  { %2267 = vmatprep.subr.bf16.mxu1 %v2901_v27 }
 0x302   :  { %2268 = vmatpush3.bf16.msra.mxu1 %v2901_v27  ;;  %v2450_v27 = vld [vmem:[#allocation8 + $0x60] sm:$0xff]  }
 0x305   :  { %2270 = vmatmul.mubr.bf16.vlgmr.msra.gmra.mxu1 %v126_v35  ;;  %v2440_v35 = vld [vmem:[#allocation7 + $0x70] sm:$0xff]  }
 0x306   :  { %2273 = vmatprep.mubr.bf16.mxu1 %v127_v36  ;;  %2287 = vmatprep.subr.bf16.mxu0 %v2440_v35  ;;  %v2441_v36 = vld [vmem:[#allocation7 + $0x68] sm:$0xff]  }
 0x307   :  { %2288 = vmatpush3.bf16.msra.mxu0 %v2440_v35 }
 0x308   :  { %2289 = vmatprep.subr.bf16.mxu0 %v2441_v36 }
 0x30b   :  { %2290 = vmatpush3.bf16.msra.mxu0 %v2441_v36  ;;  %v279_v36 = vadd.f32 %v2993_v14, %v2828_v47 }
 0x30c   :  { %2291 = vmatprep.subr.bf16.mxu0 %v2442_v33 }
 0x30d   :  { %2274 = vmatmul.mubr.bf16.gmra.mxu1 %v128_v40  ;;  %v2443_v40 = vld [vmem:[#allocation7 + $0x58] sm:$0xff]  }
 0x30e   :  { %2277 = vmatprep.mubr.bf16.mxu1 %v129_v41  ;;  %v2445_v41 = vld [vmem:[#allocation7 + $0x48] sm:$0xff]  }
 0x30f   :  { %2292 = vmatpush3.bf16.msra.mxu0 %v2442_v33 }
 0x310   :  { %2293 = vmatprep.subr.bf16.mxu0 %v2443_v40 }
 0x313   :  { %2294 = vmatpush3.bf16.msra.mxu0 %v2443_v40  ;;  %v290_v40 = vadd.f32 %v2830_v49, %v2993_v14 }
 0x314   :  { %2295 = vmatprep.subr.bf16.mxu0 %v2444_v38 }
 0x315   :  { %2278 = vmatmul.mubr.bf16.gmra.mxu1 %v130_v45  ;;  %v2447_v45 = vld [vmem:[#allocation8 + $0x78] sm:$0xff]  }
 0x316   :  { %2281 = vmatprep.mubr.bf16.mxu1 %v131_v46  ;;  %v2448_v46 = vld [vmem:[#allocation8 + $0x70] sm:$0xff]   ;;  %2317 = vmatprep.subr.bf16.mxu1 %v2447_v45 }
 0x317   :  { %2296 = vmatpush3.bf16.msra.mxu0 %v2444_v38  ;;  %2318 = vmatpush3.bf16.msra.mxu1 %v2447_v45  ;;  %v303_v45 = vadd.f32 %v2834_v51, %v2993_v14 }
 0x318   :  { %2297 = vmatprep.subr.bf16.mxu0 %v2445_v41  ;;  %2319 = vmatprep.subr.bf16.mxu1 %v2448_v46 }
 0x31b   :  { %2298 = vmatpush3.bf16.msra.mxu0 %v2445_v41  ;;  %2320 = vmatpush3.bf16.msra.mxu1 %v2448_v46  ;;  %v282_v41 = vadd.f32 %v2993_v14, %v2832_v50 }
 0x31c   :  { %2299 = vmatprep.subr.bf16.mxu0 %v2446_v43 }
 0x31d   :  { %2282 = vmatmul.mubr.bf16.gmra.mxu1 %v132_v48  ;;  %v2449_v48 = vld [vmem:[#allocation8 + $0x68] sm:$0xff]  }
 0x31e   :  { %2321 = vmatprep.subr.bf16.mxu1 %v2449_v48 }
 0x31f   :  { %2300 = vmatpush3.bf16.msra.mxu0 %v2446_v43  ;;  %2322 = vmatpush3.bf16.msra.mxu1 %v2449_v48  ;;  %v295_v48 = vadd.f32 %v2993_v14, %v2836_v52  ;;  %v1176_v52 = vmul.f32 1.1, %v2884_v25 }
 0x320   :  { %2323 = vmatprep.subr.bf16.mxu1 %v2450_v27 }
 0x323   :  { %2324 = vmatpush3.bf16.msra.mxu1 %v2450_v27 }
 0x324   :  { %2325 = vmatprep.subr.bf16.mxu1 %v2451_v9 }
 0x327   :  { %2326 = vmatpush3.bf16.msra.mxu1 %v2451_v9  ;;  %v306_v9 = vadd.f32 %v2838_v53, %v2993_v14 }
 0x391   :  { %v2239_v24 = vpop.f32.mrf.mxu0 }
 0x392   :  { %v2999_v62 = vadd.f32 %v2239_v24, %v255_v19 }
 0x393   :  { %v999_v7 = vpop.f32.mrf.mxu0 }
 0x394   :  { %v3003_v8 = vadd.f32 %v999_v7, %v247_v63 }
 0x395   :  { %v2240_v15 = vpop.f32.mrf.mxu0 }
 0x396   :  { %v3007_v22 = vadd.f32 %v2240_v15, %v258_v5  ;;  %v1178_v5 = vmul.f32 1.1, %v2880_v18  ;;  %v1175_v15 = vmul.f32 1.1, %v2892_v26 }
 0x397   :  { %v1002_v6 = vpop.f32.mrf.mxu0 }
 0x398   :  { %v3011_v28 = vadd.f32 %v1002_v6, %v250_v21  ;;  %v1177_v21 = vmul.f32 1.1, %v2889_v4 }
 0x399   :  { %v2243_v30 = vpop.f32.mrf.mxu0 }
 0x39a   :  { %v3015_v10 = vadd.f32 %v2243_v30, %v271_v29 }
 0x39b   :  { %v1015_v31 = vpop.f32.mrf.mxu0 }
 0x39c   :  { %v3019_v23 = vadd.f32 %v1015_v31, %v263_v13 }
 0x39d   :  { %v2244_v32 = vpop.f32.mrf.mxu0 }
 0x39e   :  { %v3023_v20 = vadd.f32 %v2244_v32, %v274_v12 }
 0x39f   :  { %v1018_v34 = vpop.f32.mrf.mxu0 }
 0x3a0   :  { %v3027_v35 = vadd.f32 %v1018_v34, %v266_v17 }
 0x3a1   :  { %v2247_v37 = vpop.f32.mrf.mxu0 }
 0x3a2   :  { %v3031_v33 = vadd.f32 %v2247_v37, %v287_v11  ;;  %v1182_v11 = vmul.f32 1.1, %v2918_v2  ;;  %v1179_v37 = vmul.f32 1.1, %v2915_v1 }
 0x3a3   :  { %v1031_v39 = vpop.f32.mrf.mxu0 }
 0x3a4   :  { %v3035_v38 = vadd.f32 %v1031_v39, %v279_v36  ;;  %v1180_v36 = vmul.f32 1.1, %v2921_v0  ;;  %v1181_v39 = vmul.f32 1.1, %v2928_v60 }
 0x3a5   :  { %v2248_v42 = vpop.f32.mrf.mxu0 }
 0x3a6   :  { %v3039_v43 = vadd.f32 %v2248_v42, %v290_v40 }
 0x3a7   :  { %v1034_v44 = vpop.f32.mrf.mxu0 }
 0x3a8   :  { %v3043_v46 = vadd.f32 %v1034_v44, %v282_v41 }
 0x3a9   :  { %v2251_v47 = vpop.f32.mrf.mxu0 }
 0x3aa   :  { %v3047_v27 = vadd.f32 %v2251_v47, %v303_v45 }
 0x3ab   :  { %v1047_v49 = vpop.f32.mrf.mxu0 }
 0x3ac   :  { %v3051_v19 = vadd.f32 %v1047_v49, %v295_v48 }
 0x3ad   :  { %v2252_v50 = vpop.f32.mrf.mxu0 }
 0x3ae   :  { %v3053_v24 = vadd.f32 %v2252_v50, %v306_v9 }
 0x3c5   :  { %v2271_v63 = vpop.f32.mrf.mxu1 }
 0x3c6   :  { %v1193_v13 = vadd.f32 %v2271_v63, %v1177_v21  ;;  %v1186_v63 = vmul.f32 1.1, %v2943_v59 }
 0x3c7   :  { %v1112_v7 = vpop.f32.mrf.mxu1 }
 0x3c8   :  { %v1191_v30 = vadd.f32 %v1175_v15, %v1112_v7  ;;  %v1183_v7 = vmul.f32 1.1, %v2947_v57 }
 0x3c9   :  { %v2272_v51 = vpop.f32.mrf.mxu1 }
 0x3ca   :  { %v1194_v6 = vadd.f32 %v2272_v51, %v1178_v5  ;;  %v1184_v51 = vmul.f32 1.1, %v2949_v61  ;;  %v1185_v5 = vmul.f32 1.1, %v2951_v3 }
 0x3cb   :  { %v1115_v29 = vpop.f32.mrf.mxu1 }
 0x3cc   :  { %v1192_v53 = vadd.f32 %v1176_v52, %v1115_v29  ;;  %v1208_v32 = vpack.c.bf16 %v1194_v6, %v1193_v13 }
 0x3cd   :  { %v2275_v31 = vpop.f32.mrf.mxu1 }
 0x3ce   :  { %v1207_v12 = vpack.c.bf16 %v1192_v53, %v1191_v30  ;;  %v1197_v45 = vadd.f32 %v2275_v31, %v1181_v39 }
 0x3cf   :  { %v1128_v17 = vpop.f32.mrf.mxu1 }
 0x3d0   :  { %2301 = vmatprep.mubr.bf16.mxu0 %v1207_v12  ;;  %v1195_v41 = vadd.f32 %v1179_v37, %v1128_v17  ;;  %v1187_v17 = vmul.f32 1.1, %v2964_v56 }
 0x3d1   :  { %v2276_v34 = vpop.f32.mrf.mxu1  ;;  %2302 = vmatmul.mubr.bf16.vlgmr.msra.gmra.mxu0 %v1208_v32  ;;  %v1190_v32 = vmul.f32 1.1, %v2962_v16 }
 0x3d2   :  { %v1198_v40 = vadd.f32 %v2276_v34, %v1182_v11  ;;  %v1188_v34 = vmul.f32 1.1, %v2966_v55  ;;  %v1189_v11 = vmul.f32 1.1, %v2960_v58 }
 0x3d3   :  { %v1131_v42 = vpop.f32.mrf.mxu1 }
 0x3d4   :  { %v1196_v44 = vadd.f32 %v1180_v36, %v1131_v42  ;;  %v1210_v49 = vpack.c.bf16 %v1198_v40, %v1197_v45  ;;  %v2452_v45 = vld [vmem:[#allocation8 + $0x50] sm:$0xff]  }
 0x3d5   :  { %v2279_v47 = vpop.f32.mrf.mxu1  ;;  %2327 = vmatprep.subr.bf16.mxu1 %v2452_v45 }
 0x3d6   :  { %v1209_v48 = vpack.c.bf16 %v1196_v44, %v1195_v41  ;;  %v1201_v29 = vadd.f32 %v2279_v47, %v1185_v5  ;;  %2328 = vmatpush3.bf16.msra.mxu1 %v2452_v45  ;;  %v2453_v47 = vld [vmem:[#allocation8 + $0x48] sm:$0xff]   ;;  %v1921_v5 = vld [vmem:[%s3182_s3 + $0x1] ss:$0 sm:$0xff] }
 0x3d7   :  { %v1144_v9 = vpop.f32.mrf.mxu1  ;;  %2329 = vmatprep.subr.bf16.mxu1 %v2453_v47 }
 0x3d8   :  { %2305 = vmatprep.mubr.bf16.mxu0 %v1209_v48  ;;  %v1199_v21 = vadd.f32 %v1183_v7, %v1144_v9  ;;  %v2454_v48 = vld [vmem:[#allocation8 + $0x40] sm:$0xff]   ;;  %v2456_v9 = vld [vmem:[#allocation10 + $0xb0] sm:$0xff]  }
 0x3d9   :  { %v2280_v50 = vpop.f32.mrf.mxu1  ;;  %2306 = vmatmul.mubr.bf16.gmra.mxu0 %v1210_v49  ;;  %v2455_v49 = vld [vmem:[#allocation10 + $0xb8] sm:$0xff]  }
 0x3da   :  { %v1202_v15 = vadd.f32 %v2280_v50, %v1186_v63  ;;  %2330 = vmatpush3.bf16.msra.mxu1 %v2453_v47  ;;  %2349 = vmatprep.subr.bf16.mxu0 %v2455_v49  ;;  %v2457_v50 = vld [vmem:[#allocation10 + $0xa8] sm:$0xff]   ;;  %v3071_v63 = vpop.f32.mrf.mxu0 }
 0x3db   :  { %v1147_v52 = vpop.f32.mrf.mxu1  ;;  %2331 = vmatprep.subr.bf16.mxu1 %v2454_v48  ;;  %2350 = vmatpush3.bf16.msra.mxu0 %v2455_v49 }
 0x3dc   :  { %v1200_v6 = vadd.f32 %v1184_v51, %v1147_v52  ;;  %v1212_v13 = vpack.c.bf16 %v1202_v15, %v1201_v29  ;;  %2351 = vmatprep.subr.bf16.mxu0 %v2456_v9 }
 0x3dd   :  { %v2283_v30 = vpop.f32.mrf.mxu1 }
 0x3de   :  { %v1211_v53 = vpack.c.bf16 %v1200_v6, %v1199_v21  ;;  %v1205_v42 = vadd.f32 %v2283_v30, %v1189_v11  ;;  %2332 = vmatpush3.bf16.msra.mxu1 %v2454_v48 }
 0x3df   :  { %v1160_v31 = vpop.f32.mrf.mxu1  ;;  %2381 = vmatprep.subr.bf16.mxu1 %v2455_v49  ;;  %2352 = vmatpush3.bf16.msra.mxu0 %v2456_v9 }
 0x3e0   :  { %2309 = vmatprep.mubr.bf16.mxu0 %v1211_v53  ;;  %v1203_v39 = vadd.f32 %v1187_v17, %v1160_v31  ;;  %2353 = vmatprep.subr.bf16.mxu0 %v2457_v50 }
 0x3e1   :  { %v2284_v12 = vpop.f32.mrf.mxu1  ;;  %2310 = vmatmul.mubr.bf16.gmra.mxu0 %v1212_v13 }
 0x3e2   :  { %v1206_v37 = vadd.f32 %v2284_v12, %v1190_v32 }
 0x3e3   :  { %v1163_v36 = vpop.f32.mrf.mxu1  ;;  %2354 = vmatpush3.bf16.msra.mxu0 %v2457_v50 }
 0x3e4   :  { %v1204_v40 = vadd.f32 %v1188_v34, %v1163_v36  ;;  %v1214_v44 = vpack.c.bf16 %v1206_v37, %v1205_v42 }
 0x3e6   :  { %v1213_v41 = vpack.c.bf16 %v1204_v40, %v1203_v39 }
 0x3e8   :  { %2313 = vmatprep.mubr.bf16.mxu0 %v1213_v41 }
 0x3e9   :  { %2314 = vmatmul.mubr.bf16.gmra.mxu0 %v1214_v44 }
 0x491   :  { %v2303_v7 = vpop.f32.mrf.mxu0 }
 0x492   :  { %v1328_v6 = vadd.f32 %v2303_v7, %v1921_v5 }
 0x493   :  { %v1319_v51 = vpop.f32.mrf.mxu0 }
 0x494   :  { %v1320_v52 = vadd.f32 %v1921_v5, %v1319_v51  ;;  %v1384_v32 = vmax.f32 %v1328_v6, 0.0 }
 0x495   :  { %v2304_v15 = vpop.f32.mrf.mxu0 }
 0x496   :  { %v1331_v21 = vadd.f32 %v2304_v15, %v1921_v5  ;;  %v1382_v31 = vmax.f32 %v1320_v52, 0.0 }
 0x497   :  { %v1322_v29 = vpop.f32.mrf.mxu0 }
 0x498   :  { %v1323_v30 = vadd.f32 %v1921_v5, %v1322_v29  ;;  %v1385_v53 = vmax.f32 %v1331_v21, 0.0 }
 0x499   :  { %v2307_v13 = vpop.f32.mrf.mxu0 }
 0x49a   :  { %v1383_v12 = vmax.f32 %v1323_v30, 0.0  ;;  %v1399_v11 = vpack.c.bf16 %v1385_v53, %v1384_v32  ;;  %v1344_v40 = vadd.f32 %v2307_v13, %v1921_v5 }
 0x49b   :  { %v1335_v17 = vpop.f32.mrf.mxu0 }
 0x49c   :  { %v1398_v34 = vpack.c.bf16 %v1383_v12, %v1382_v31  ;;  %v1336_v36 = vadd.f32 %v1921_v5, %v1335_v17  ;;  %v1388_v7 = vmax.f32 %v1344_v40, 0.0 }
 0x49d   :  { %v2308_v37 = vpop.f32.mrf.mxu0 }
 0x49e   :  { %v1347_v39 = vadd.f32 %v2308_v37, %v1921_v5  ;;  %2333 = vmatprep.mubr.bf16.mxu1 %v1398_v34  ;;  %v1386_v47 = vmax.f32 %v1336_v36, 0.0 }
 0x49f   :  { %v1338_v42 = vpop.f32.mrf.mxu0  ;;  %2334 = vmatmul.mubr.bf16.vlgmr.msra.gmra.mxu1 %v1399_v11 }
 0x4a0   :  { %v1339_v41 = vadd.f32 %v1921_v5, %v1338_v42  ;;  %2389 = vmatpush3.bf16.msra.mxu1 %v2455_v49  ;;  %v1389_v44 = vmax.f32 %v1347_v39, 0.0 }
 0x4a1   :  { %v2311_v45 = vpop.f32.mrf.mxu0  ;;  %2382 = vmatprep.subr.bf16.mxu1 %v2456_v9 }
 0x4a2   :  { %v1387_v48 = vmax.f32 %v1339_v41, 0.0  ;;  %v1401_v52 = vpack.c.bf16 %v1389_v44, %v1388_v7  ;;  %v1360_v30 = vadd.f32 %v2311_v45, %v1921_v5 }
 0x4a3   :  { %v1351_v51 = vpop.f32.mrf.mxu0 }
 0x4a4   :  { %v1400_v15 = vpack.c.bf16 %v1387_v48, %v1386_v47  ;;  %2390 = vmatpush3.bf16.msra.mxu1 %v2456_v9  ;;  %v1352_v6 = vadd.f32 %v1921_v5, %v1351_v51  ;;  %v1392_v17 = vmax.f32 %v1360_v30, 0.0  ;;  %v2458_v51 = vld [vmem:[#allocation10 + $0xa0] sm:$0xff]  }
 0x4a5   :  { %v2312_v21 = vpop.f32.mrf.mxu0  ;;  %2383 = vmatprep.subr.bf16.mxu1 %v2457_v50  ;;  %2355 = vmatprep.subr.bf16.mxu0 %v2458_v51 }
 0x4a6   :  { %v1363_v29 = vadd.f32 %v2312_v21, %v1921_v5  ;;  %2337 = vmatprep.mubr.bf16.mxu1 %v1400_v15  ;;  %v1390_v12 = vmax.f32 %v1352_v6, 0.0  ;;  %2356 = vmatpush3.bf16.msra.mxu0 %v2458_v51  ;;  %v2459_v15 = vld [vmem:[#allocation10 + $0x98] sm:$0xff]   ;;  %v2462_v21 = vld [vmem:[#allocation10 + $0x80] sm:$0xff]  }
 0x4a7   :  { %v1354_v53 = vpop.f32.mrf.mxu0  ;;  %2338 = vmatmul.mubr.bf16.gmra.mxu1 %v1401_v52  ;;  %2357 = vmatprep.subr.bf16.mxu0 %v2459_v15  ;;  %v2460_v52 = vld [vmem:[#allocation10 + $0x90] sm:$0xff]   ;;  %v3079_v6 = vld [vmem:[%s3184_s5 + $0x1] ss:$0 sm:$0xff]  ;;  %s2608_s5 = smov [#allocation11]  }
 0x4a8   :  { %v1355_v13 = vadd.f32 %v1921_v5, %v1354_v53  ;;  %2391 = vmatpush3.bf16.msra.mxu1 %v2457_v50  ;;  %v1393_v49 = vmax.f32 %v1363_v29, 0.0  ;;  %v3085_v53 = vld [vmem:[%s3185_s6 + $0x1] ss:$0 sm:$0xff]  ;;  %s1870_s6 = sshll.u32 %s2608_s5, 4  ;;  %s1871_s6 = int_to_ptr.vmem [resolvable:$true] %s1870_s6 }
 0x4a9   :  { %v2315_v31 = vpop.f32.mrf.mxu0  ;;  %2384 = vmatprep.subr.bf16.mxu1 %v2458_v51  ;;  %p2576_p12 = scmp.lt.s32.totalorder %s1871_s6, %s1871_s6 }
 0x4aa   :  { %v1391_v32 = vmax.f32 %v1355_v13, 0.0  ;;  %v1403_v37 = vpack.c.bf16 %v1393_v49, %v1392_v17  ;;  %v1376_v40 = vadd.f32 %v2315_v31, %v1921_v5  ;;  %2358 = vmatpush3.bf16.msra.mxu0 %v2459_v15  ;;  %v3092_v17 = vld [vmem:[%s3186_s7 + $0x1] ss:$0 sm:$0xff]  ;;  %s2571_s7 = scalar_lea.vmem %s1871_s6, 2048 }
 0x4ab   :  { %v1367_v34 = vpop.f32.mrf.mxu0  ;;  %2359 = vmatprep.subr.bf16.mxu0 %v2460_v52  ;;  %p2572_p11 = scmp.ne.s32.totalorder %s1871_s6, %s2571_s7  ;;  %p2577_p13 = scmp.lt.s32.totalorder %s2571_s7, %s2571_s7 }
 0x4ac   :  { %v1402_v11 = vpack.c.bf16 %v1391_v32, %v1390_v12  ;;  %v1368_v36 = vadd.f32 %v1921_v5, %v1367_v34  ;;  %v1396_v50 = vmax.f32 %v1376_v40, 0.0  ;;  %2392 = vmatpush3.bf16.msra.mxu1 %v2458_v51 }
 0x4ad   :  { %v2316_v9 = vpop.f32.mrf.mxu0  ;;  %2385 = vmatprep.subr.bf16.mxu1 %v2459_v15  ;;  %p2578_p0 = por %p2577_p13, %p2576_p12 }
 0x4ae   :  { %v1379_v39 = vadd.f32 %v2316_v9, %v1921_v5  ;;  %2341 = vmatprep.mubr.bf16.mxu1 %v1402_v11  ;;  %v1394_v45 = vmax.f32 %v1368_v36, 0.0  ;;  %2360 = vmatpush3.bf16.msra.mxu0 %v2460_v52 }
 0x4af   :  { %v1370_v42 = vpop.f32.mrf.mxu0  ;;  %2342 = vmatmul.mubr.bf16.gmra.mxu1 %v1403_v37  ;;  %p2579_p1 = pnand %p2578_p0, %p2572_p11 }
 0x4b0   :  { %v1371_v41 = vadd.f32 %v1921_v5, %v1370_v42  ;;  %v1397_v44 = vmax.f32 %v1379_v39, 0.0  ;;  %2393 = vmatpush3.bf16.msra.mxu1 %v2459_v15  ;;  %v2461_v5 = vld [vmem:[#allocation10 + $0x88] sm:$0xff]  }
 0x4b1   :  { %2386 = vmatprep.subr.bf16.mxu1 %v2460_v52  ;;  %2361 = vmatprep.subr.bf16.mxu0 %v2461_v5 }
 0x4b2   :  { %v1395_v47 = vmax.f32 %v1371_v41, 0.0  ;;  %v1405_v7 = vpack.c.bf16 %v1397_v44, %v1396_v50  ;;  %2362 = vmatpush3.bf16.msra.mxu0 %v2461_v5 }
 0x4b3   :  { %2363 = vmatprep.subr.bf16.mxu0 %v2462_v21 }
 0x4b4   :  { %v1404_v48 = vpack.c.bf16 %v1395_v47, %v1394_v45  ;;  %2394 = vmatpush3.bf16.msra.mxu1 %v2460_v52 }
 0x4b5   :  { %2387 = vmatprep.subr.bf16.mxu1 %v2461_v5 }
 0x4b6   :  { %2345 = vmatprep.mubr.bf16.mxu1 %v1404_v48  ;;  %2364 = vmatpush3.bf16.msra.mxu0 %v2462_v21 }
 0x4b7   :  { %2346 = vmatmul.mubr.bf16.gmra.mxu1 %v1405_v7 }
 0x4b8   :  { %2395 = vmatpush3.bf16.msra.mxu1 %v2461_v5 }
 0x4b9   :  { %2388 = vmatprep.subr.bf16.mxu1 %v2462_v21 }
 0x4bc   :  { %2396 = vmatpush3.bf16.msra.mxu1 %v2462_v21 }
 0x55f   :  { %v2335_v29 = vpop.f32.mrf.mxu1 }
 0x560   :  { %v1519_v30 = vadd.f32 %v2335_v29, %v3079_v6 }
 0x561   :  { %v1510_v13 = vpop.f32.mrf.mxu1 }
 0x562   :  { %v1575_v49 = vmax.f32 %v1519_v30, 0.0  ;;  %v1511_v31 = vadd.f32 %v3079_v6, %v1510_v13 }
 0x563   :  { %v2336_v12 = vpop.f32.mrf.mxu1 }
 0x564   :  { %v1596_v32 = vmul.f32 %v3085_v53, %v1575_v49  ;;  %v1573_v34 = vmax.f32 %v1511_v31, 0.0  ;;  %v1522_v11 = vadd.f32 %v2336_v12, %v3079_v6 }
 0x565   :  { %v1513_v37 = vpop.f32.mrf.mxu1 }
 0x566   :  { %v1594_v9 = vmul.f32 %v3085_v53, %v1573_v34  ;;  %v1576_v36 = vmax.f32 %v1522_v11, 0.0  ;;  %v1514_v39 = vadd.f32 %v3079_v6, %v1513_v37  ;;  %v1617_v40 = vadd.f32 %v3092_v17, %v1596_v32 }
 0x567   :  { %v2339_v42 = vpop.f32.mrf.mxu1 }
 0x568   :  { %v1597_v41 = vmul.f32 %v3085_v53, %v1576_v36  ;;  %v1574_v44 = vmax.f32 %v1514_v39, 0.0  ;;  %v1615_v45 = vadd.f32 %v3092_v17, %v1594_v9  ;;  %v1535_v47 = vadd.f32 %v2339_v42, %v3079_v6 }
 0x569   :  { %v1526_v50 = vpop.f32.mrf.mxu1  ;;  %v1633_v51 = vmax.f32 %v1617_v40, 0.0 }
 0x56a   :  { %v1618_v48 = vadd.f32 %v3092_v17, %v1597_v41  ;;  %v1595_v7 = vmul.f32 %v3085_v53, %v1574_v44  ;;  %v1579_v15 = vmax.f32 %v1535_v47, 0.0  ;;  %v1527_v52 = vadd.f32 %v3079_v6, %v1526_v50 }
 0x56b   :  { %v2340_v5 = vpop.f32.mrf.mxu1  ;;  %v1631_v13 = vmax.f32 %v1615_v45, 0.0  ;;  %v1649_v37 = vadd.f32 %v1633_v51, %v2889_v4 }
 0x56c   :  { %v1634_v21 = vmax.f32 %v1618_v48, 0.0  ;;  %v1616_v29 = vadd.f32 %v3092_v17, %v1595_v7  ;;  %v1538_v30 = vadd.f32 %v2340_v5, %v3079_v6  ;;  %v1600_v49 = vmul.f32 %v3085_v53, %v1579_v15 }
 0x56d   :  { %v1577_v31 = vmax.f32 %v1527_v52, 0.0  ;;  %v1529_v12 = vpop.f32.mrf.mxu1  ;;  %v1647_v50 = vadd.f32 %v1631_v13, %v2892_v26 }
 0x56e   :  { %v1632_v32 = vmax.f32 %v1616_v29, 0.0  ;;  %v1580_v34 = vmax.f32 %v1538_v30, 0.0  ;;  %v1530_v11 = vadd.f32 %v3079_v6, %v1529_v12  ;;  %v1650_v39 = vadd.f32 %v1634_v21, %v2880_v18 }
 0x56f   :  { %v1598_v9 = vmul.f32 %v3085_v53, %v1577_v31  ;;  %v2343_v36 = vpop.f32.mrf.mxu1  ;;  %v1621_v44 = vadd.f32 %v3092_v17, %v1600_v49 }
 0x570   :  { %v1601_v40 = vmul.f32 %v3085_v53, %v1580_v34  ;;  %v1578_v42 = vmax.f32 %v1530_v11, 0.0  ;;  %v1551_v41 = vadd.f32 %v2343_v36, %v3079_v6  ;;  %v1648_v48 = vadd.f32 %v1632_v32, %v2884_v25 }
 0x571   :  { %v1619_v45 = vadd.f32 %v3092_v17, %v1598_v9  ;;  %v1542_v47 = vpop.f32.mrf.mxu1  ;;  %v1664_v5 = vpack.c.bf16 %v1650_v39, %v1649_v37  ;;  %v1637_v13 = vmax.f32 %v1621_v44, 0.0 }
 0x572   :  { %v1622_v4 = vadd.f32 %v3092_v17, %v1601_v40  ;;  %v1599_v7 = vmul.f32 %v3085_v53, %v1578_v42  ;;  %v1583_v51 = vmax.f32 %v1551_v41, 0.0  ;;  %v1543_v18 = vadd.f32 %v3079_v6, %v1542_v47 }
 0x573   :  { %v2344_v15 = vpop.f32.mrf.mxu1  ;;  %v1663_v52 = vpack.c.bf16 %v1648_v48, %v1647_v50  ;;  %v1635_v49 = vmax.f32 %v1619_v45, 0.0 }
 0x574   :  { %v1638_v21 = vmax.f32 %v1622_v4, 0.0  ;;  %v1620_v29 = vadd.f32 %v3092_v17, %v1599_v7  ;;  %v1581_v30 = vmax.f32 %v1543_v18, 0.0  ;;  %v1604_v31 = vmul.f32 %v3085_v53, %v1583_v51 }
 0x575   :  { %v1554_v26 = vadd.f32 %v2344_v15, %v3079_v6  ;;  %2365 = vmatprep.mubr.bf16.mxu0 %v1663_v52  ;;  %v1545_v25 = vpop.f32.mrf.mxu1  ;;  %v1651_v45 = vadd.f32 %v1635_v49, %v2915_v1  ;;  %v1653_v4 = vadd.f32 %v1637_v13, %v2928_v60 }
 0x576   :  { %v1636_v12 = vmax.f32 %v1620_v29, 0.0  ;;  %v1602_v32 = vmul.f32 %v3085_v53, %v1581_v30  ;;  %v1546_v34 = vadd.f32 %v3079_v6, %v1545_v25  ;;  %2366 = vmatmul.mubr.bf16.vlgmr.msra.gmra.mxu0 %v1664_v5  ;;  %v1654_v40 = vadd.f32 %v1638_v21, %v2918_v2 }
 0x577   :  { %v1584_v11 = vmax.f32 %v1554_v26, 0.0  ;;  %v2347_v37 = vpop.f32.mrf.mxu1  ;;  %v1625_v42 = vadd.f32 %v3092_v17, %v1604_v31 }
 0x578   :  { %v1623_v9 = vadd.f32 %v3092_v17, %v1602_v32  ;;  %v1582_v36 = vmax.f32 %v1546_v34, 0.0  ;;  %v1567_v39 = vadd.f32 %v2347_v37, %v3079_v6  ;;  %v1652_v47 = vadd.f32 %v1636_v12, %v2921_v0 }
 0x579   :  { %v1605_v41 = vmul.f32 %v3085_v53, %v1584_v11  ;;  %v1558_v44 = vpop.f32.mrf.mxu1  ;;  %v1666_v21 = vpack.c.bf16 %v1654_v40, %v1653_v4  ;;  %v1641_v1 = vmax.f32 %v1625_v42, 0.0 }
 0x57a   :  { %v1603_v50 = vmul.f32 %v3085_v53, %v1582_v36  ;;  %v1587_v48 = vmax.f32 %v1567_v39, 0.0  ;;  %v1559_v51 = vadd.f32 %v3079_v6, %v1558_v44  ;;  %v1665_v2 = vpack.c.bf16 %v1652_v47, %v1651_v45 }
 0x57b   :  { %v1626_v7 = vadd.f32 %v3092_v17, %v1605_v41  ;;  %v2348_v18 = vpop.f32.mrf.mxu1  ;;  %v1639_v15 = vmax.f32 %v1623_v9, 0.0  ;;  %v1657_v37 = vadd.f32 %v1641_v1, %v2951_v3 }
 0x57c   :  { %v1624_v52 = vadd.f32 %v3092_v17, %v1603_v50  ;;  %v1570_v5 = vadd.f32 %v2348_v18, %v3079_v6  ;;  %v1608_v0 = vmul.f32 %v3085_v53, %v1587_v48  ;;  %v1585_v30 = vmax.f32 %v1559_v51, 0.0  ;;  %2369 = vmatprep.mubr.bf16.mxu0 %v1665_v2 }
 0x57d   :  { %v1642_v29 = vmax.f32 %v1626_v7, 0.0  ;;  %v1561_v49 = vpop.f32.mrf.mxu1  ;;  %v1655_v34 = vadd.f32 %v1639_v15, %v2947_v57 }
 0x57e   :  { %v1640_v60 = vmax.f32 %v1624_v52, 0.0  ;;  %v1588_v31 = vmax.f32 %v1570_v5, 0.0  ;;  %v1562_v26 = vadd.f32 %v3079_v6, %v1561_v49  ;;  %2370 = vmatmul.mubr.bf16.gmra.mxu0 %v1666_v21  ;;  %v1606_v13 = vmul.f32 %v3085_v53, %v1585_v30 }
 0x57f   :  { %v1658_v25 = vadd.f32 %v1642_v29, %v2943_v59  ;;  %v1629_v9 = vadd.f32 %v3092_v17, %v1608_v0 }
 0x580   :  { %v1609_v12 = vmul.f32 %v3085_v53, %v1588_v31  ;;  %v1586_v32 = vmax.f32 %v1562_v26, 0.0  ;;  %v1656_v11 = vadd.f32 %v1640_v60, %v2949_v61  ;;  %v1627_v36 = vadd.f32 %v3092_v17, %v1606_v13 }
 0x581   :  { %v1668_v40 = vpack.c.bf16 %v1658_v25, %v1657_v37  ;;  %v1645_v57 = vmax.f32 %v1629_v9, 0.0 }
 0x582   :  { %v1630_v6 = vadd.f32 %v3092_v17, %v1609_v12  ;;  %v1607_v39 = vmul.f32 %v3085_v53, %v1586_v32  ;;  %v1667_v59 = vpack.c.bf16 %v1656_v11, %v1655_v34  ;;  %v1643_v42 = vmax.f32 %v1627_v36, 0.0 }
 0x583   :  { %v1661_v50 = vadd.f32 %v1645_v57, %v2960_v58 }
 0x584   :  { %v1646_v41 = vmax.f32 %v1630_v6, 0.0  ;;  %v1628_v44 = vadd.f32 %v3092_v17, %v1607_v39  ;;  %2373 = vmatprep.mubr.bf16.mxu1 %v1667_v59  ;;  %v1659_v45 = vadd.f32 %v1643_v42, %v2964_v56 }
 0x585   :  { %2374 = vmatmul.mubr.bf16.vlgmr.msra.gmra.mxu1 %v1668_v40 }
 0x586   :  { %v1644_v61 = vmax.f32 %v1628_v44, 0.0  ;;  %v1662_v3 = vadd.f32 %v1646_v41, %v2962_v16 }
 0x588   :  { %v1660_v47 = vadd.f32 %v1644_v61, %v2966_v55  ;;  %v1670_v53 = vpack.c.bf16 %v1662_v3, %v1661_v50 }
 0x58a   :  { %v1669_v48 = vpack.c.bf16 %v1660_v47, %v1659_v45 }
 0x58c   :  { %2377 = vmatprep.mubr.bf16.mxu1 %v1669_v48 }
 0x58d   :  { %2378 = vmatmul.mubr.bf16.gmra.mxu1 %v1670_v53 }
 0x636   :  { %v2367_v4 = vpop.f32.mrf.mxu0 }
 0x637   :  { %v1835_v7 = vadd.f32 %v2367_v4, %v2999_v62 }
 0x638   :  { %v1770_v17 = vpop.f32.mrf.mxu0 }
 0x639   :  { %1851 = vst [vmem:[#allocation11 + $0x10] sm:$0xff] %v1835_v7  ;;  %v1833_v51 = vadd.f32 %v1770_v17, %v3003_v8 }
 0x63a   :  { %v2368_v18 = vpop.f32.mrf.mxu0 }
 0x63b   :  { %1849 = vst [vmem:[#allocation11] sm:$0xff] %v1833_v51  ;;  %v1836_v16 = vadd.f32 %v2368_v18, %v3007_v22 }
 0x63c   :  { %v1773_v56 = vpop.f32.mrf.mxu0 }
 0x63d   :  { %1852 = vst [vmem:[#allocation11 + $0x18] sm:$0xff] %v1836_v16  ;;  %v1834_v55 = vadd.f32 %v1773_v56, %v3011_v28 }
 0x63e   :  { %v2371_v58 = vpop.f32.mrf.mxu0 }
 0x63f   :  { %1850 = vst [vmem:[#allocation11 + $0x8] sm:$0xff] %v1834_v55  ;;  %v1839_v2 = vadd.f32 %v2371_v58, %v3015_v10 }
 0x640   :  { %v1786_v15 = vpop.f32.mrf.mxu0 }
 0x641   :  { %1855 = vst [vmem:[#allocation11 + $0x30] sm:$0xff] %v1839_v2  ;;  %v1837_v62 = vadd.f32 %v1786_v15, %v3019_v23 }
 0x642   :  { %v2372_v52 = vpop.f32.mrf.mxu0 }
 0x643   :  { %1853 = vst [vmem:[#allocation11 + $0x20] sm:$0xff] %v1837_v62  ;;  %v1840_v8 = vadd.f32 %v2372_v52, %v3023_v20 }
 0x644   :  { %v1789_v5 = vpop.f32.mrf.mxu0 }
 0x645   :  { %1856 = vst [vmem:[#allocation11 + $0x38] sm:$0xff] %v1840_v8  ;;  %v1838_v22 = vadd.f32 %v1789_v5, %v3027_v35  ;;  %v2375_v21 = vpop.f32.mrf.mxu1 }
 0x646   :  { %v1843_v1 = vadd.f32 %v2375_v21, %v3031_v33  ;;  %v298_v33 = vadd.f32 %v2993_v14, %v2840_v54 }
 0x647   :  { %1854 = vst [vmem:[#allocation11 + $0x28] sm:$0xff] %v1838_v22  ;;  %v1802_v28 = vpop.f32.mrf.mxu1 }
 0x648   :  { %1859 = vst [vmem:[#allocation11 + $0x50] sm:$0xff] %v1843_v1  ;;  %v1841_v10 = vadd.f32 %v1802_v28, %v3035_v38 }
 0x649   :  { %v2376_v29 = vpop.f32.mrf.mxu1 }
 0x64a   :  { %1857 = vst [vmem:[#allocation11 + $0x40] sm:$0xff] %v1841_v10  ;;  %v1844_v23 = vadd.f32 %v2376_v29, %v3039_v43  ;;  %v1075_v43 = vadd.f32 %v3071_v63, %v298_v33 }
 0x64b   :  { %v1805_v0 = vpop.f32.mrf.mxu1 }
 0x64c   :  { %1860 = vst [vmem:[#allocation11 + $0x58] sm:$0xff] %v1844_v23  ;;  %v1842_v20 = vadd.f32 %v1805_v0, %v3043_v46 }
 0x64d   :  { %v2379_v30 = vpop.f32.mrf.mxu1 }
 0x64e   :  { %1858 = vst [vmem:[#allocation11 + $0x48] sm:$0xff] %v1842_v20  ;;  %v1847_v35 = vadd.f32 %v2379_v30, %v3047_v27 }
 0x64f   :  { %v1818_v49 = vpop.f32.mrf.mxu1 }
 0x650   :  { %1863 = vst [vmem:[#allocation11 + $0x70] sm:$0xff] %v1847_v35  ;;  %v1845_v60 = vadd.f32 %v1818_v49, %v3051_v19 }
 0x651   :  { %v2380_v38 = vpop.f32.mrf.mxu1 }
 0x652   :  { %1861 = vst [vmem:[#allocation11 + $0x60] sm:$0xff] %v1845_v60  ;;  %v1848_v31 = vadd.f32 %v2380_v38, %v3053_v24 }
 0x653   :  { %v1821_v46 = vpop.f32.mrf.mxu1 }
 0x654   :  { %1864 = vst [vmem:[#allocation11 + $0x78] sm:$0xff] %v1848_v31  ;;  %v1846_v26 = vadd.f32 %v1821_v46, %v1075_v43 }
 0x656   :  { %1862 = vst [vmem:[#allocation11 + $0x68] sm:$0xff] %v1846_v26 }
 0x657   :  { %2582 = shalt.err (!%p2579_p1)
}
 0x658   :  { %1876 = dma.vmem_to_hbm [thread:$0]  %s1871_s6, 2048, %s3189_s10, [#allocation4], %s2600_s16, %s2600_s16, %s2601_s17  }
 0x659   :  { %2597 = dma.done.wait [#allocation4], 2048  }
 0x65a   :  { %2598 = vsyncadd [#allocation4], 4294965248 }
 0x65b   :  { %1880 = vsyncpa [#allocation3], 1 }
 0x65c   :  { %1881 = vsyncpa [#allocation6], 1 }
 0x65d   :  { %1882 = vsyncpa [#allocation9], 1 }
 0x65e   :  { %1883 = vsyncpa [#allocation4], 1 }

</bundles_post_ra>
